<compile_context>
chip_gen: v5e
topology: v5e:2x2
jax: 0.10.0
libtpu: 0.0.40
codegen_flags: <defaults>
</compile_context>

<pallas_src>
import functools

import jax
import jax.numpy as jnp
from jax import lax
from jax.experimental import pallas as pl
from jax.experimental.pallas import tpu as pltpu


# ------------------------------- kernel ------------------------------------

def _layernorm(v, g, b, eps=1e-5):
    # Single reduction pass: E[x] and E[x^2] computed together, var = E[x^2]-E[x]^2.
    m1 = jnp.mean(v, axis=-1, keepdims=True)
    m2 = jnp.mean(v * v, axis=-1, keepdims=True)
    var = m2 - m1 * m1
    return (v - m1) * lax.rsqrt(var + eps) * g + b


def _vit_layer_kernel(
    patches_ref, patch_w_ref, patch_b_ref, cls_ref, pos_ref,
    ln1g_ref, ln1b_ref, wqkv_ref, bqkv_ref, wo_ref, bo_ref,
    ln2g_ref, ln2b_ref, w1_ref, b1_ref, w2_ref, b2_ref,
    clsg_ref, clsb_ref, head_w_ref, head_b_ref,
    o_ref,
    x_buf, ctx_buf,
    *, B, S, H,
):
    l = pl.program_id(0)
    D = pos_ref.shape[-1]
    N = S - 1
    Dh = D // H
    scale = 1.0 / (Dh ** 0.5)
    bf16 = jnp.bfloat16

    # ---- step 0: patch embedding + token slab assembly (stays in VMEM) ----
    @pl.when(l == 0)
    def _():
        emb = (jnp.dot(patches_ref[...].astype(bf16), patch_w_ref[...],
                       preferred_element_type=jnp.float32)
               + patch_b_ref[...])                              # (B*N, D) f32
        cls_row = cls_ref[...] + pos_ref[0:1, :]                # (1, D)
        x_buf[:, 0:1, :] = jnp.broadcast_to(cls_row, (B, 1, D))
        x_buf[:, 1:S, :] = emb.reshape(B, N, D) + pos_ref[1:S, :][None]
        # TODO(synk): embedding dropout is identity (eval-mode semantics).

    # ---- encoder layer `l` (weights streamed one layer per grid step) ----
    x = x_buf[...]                                              # (B, S, D) f32

    # MultiheadSelfAttentionBlock: LN -> MHA, residual
    h = _layernorm(x, ln1g_ref[0], ln1b_ref[0])
    h2 = h.reshape(B * S, D).astype(bf16)
    qkv = (jnp.dot(h2, wqkv_ref[0], preferred_element_type=jnp.float32)
           + bqkv_ref[0]).reshape(B, S, 3 * D)                  # f32
    q_all = qkv[:, :, 0:D] * scale                              # fold 1/sqrt(Dh)
    k_all = qkv[:, :, D:2 * D]
    v_all = qkv[:, :, 2 * D:3 * D]

    for hd in range(H):                                         # static, H small
        lo = hd * Dh
        qh = q_all[:, :, lo:lo + Dh].astype(bf16)
        kh = k_all[:, :, lo:lo + Dh].astype(bf16)
        vh = v_all[:, :, lo:lo + Dh].astype(bf16)
        s = jnp.einsum("bqd,bkd->bqk", qh, kh,
                       preferred_element_type=jnp.float32)      # (B, S, S)
        s = s - jnp.max(s, axis=-1, keepdims=True)
        p = jnp.exp(s)                                          # f32 softmax
        p = p * pl.reciprocal(jnp.sum(p, axis=-1, keepdims=True), approx=True)
        ctx_buf[:, :, lo:lo + Dh] = jnp.einsum(
            "bqk,bkd->bqd", p.astype(bf16), vh,
            preferred_element_type=jnp.float32)
        # TODO(synk): attention dropout is identity (eval-mode semantics).

    ctx = ctx_buf[...].reshape(B * S, D).astype(bf16)
    attn = (jnp.dot(ctx, wo_ref[0], preferred_element_type=jnp.float32)
            + bo_ref[0]).reshape(B, S, D)
    x = x + attn                                                # residual 1

    # MultiLayerPerceptron: LN -> Linear -> GELU -> Linear, residual
    h = _layernorm(x, ln2g_ref[0], ln2b_ref[0])
    h2 = h.reshape(B * S, D).astype(bf16)
    z = (jnp.dot(h2, w1_ref[0], preferred_element_type=jnp.float32)
         + b1_ref[0])                                           # (B*S, M) f32
    z = 0.5 * z * (1.0 + lax.erf(z * (2.0 ** -0.5)))            # exact GELU
    mlp = (jnp.dot(z.astype(bf16), w2_ref[0], preferred_element_type=jnp.float32)
           + b2_ref[0]).reshape(B, S, D)
    x = x + mlp                                                 # residual 2
    # TODO(synk): MLP dropout layers are identity (eval-mode semantics).

    x_buf[...] = x

    # ---- last step: classifier head on the cls-token rows ----
    @pl.when(l == pl.num_programs(0) - 1)
    def _():
        cls_x = x[:, 0, :]                                      # (B, D)
        hc = _layernorm(cls_x, clsg_ref[...], clsb_ref[...])
        o_ref[...] = (jnp.dot(hc.astype(bf16), head_w_ref[...],
                              preferred_element_type=jnp.float32)
                      + head_b_ref[...])


# ------------------------------ glue / params ------------------------------

def extract_patches(x, P):
    """NCHW -> [B, N, C*P*P], element order (c, ph, pw) matching Conv2d weights."""
    B, C, H, W = x.shape
    Hp, Wp = H // P, W // P
    x = x.reshape(B, C, Hp, P, Wp, P)
    x = x.transpose(0, 2, 4, 1, 3, 5)                  # B, Hp, Wp, C, P, P
    return x.reshape(B, Hp * Wp, C * P * P)


def init_params(key, *, img_size, in_channels, patch_size, num_layers,
                embedding_dim, mlp_size, num_classes):
    D, M, L = embedding_dim, mlp_size, num_layers
    num_patches = (img_size // patch_size) ** 2
    cpp = in_channels * patch_size * patch_size
    ks = jax.random.split(key, 8)

    def w(k, shape, scale=0.02):
        return scale * jax.random.normal(k, shape, dtype=jnp.float32)

    return {
        "cls": jnp.ones((1, D), jnp.float32),                          # class_embedding
        "pos": jax.random.normal(ks[0], (1, num_patches + 1, D),
                                 dtype=jnp.float32),                   # position_embedding
        "patch_w": w(ks[1], (cpp, D)),                                 # Conv2d as matmul
        "patch_b": jnp.zeros((1, D), jnp.float32),
        # stacked per-layer encoder params (leading dim = layer)
        "ln1_g": jnp.ones((L, 1, D), jnp.float32),
        "ln1_b": jnp.zeros((L, 1, D), jnp.float32),
        "wqkv": w(ks[2], (L, D, 3 * D)),
        "bqkv": jnp.zeros((L, 1, 3 * D), jnp.float32),
        "wo": w(ks[3], (L, D, D)),
        "bo": jnp.zeros((L, 1, D), jnp.float32),
        "ln2_g": jnp.ones((L, 1, D), jnp.float32),
        "ln2_b": jnp.zeros((L, 1, D), jnp.float32),
        "w1": w(ks[4], (L, D, M)),
        "b1": jnp.zeros((L, 1, M), jnp.float32),
        "w2": w(ks[5], (L, M, D)),
        "b2": jnp.zeros((L, 1, D), jnp.float32),
        # classifier
        "cls_ln_g": jnp.ones((1, D), jnp.float32),
        "cls_ln_b": jnp.zeros((1, D), jnp.float32),
        "head_w": w(ks[6], (D, num_classes)),
        "head_b": jnp.zeros((1, num_classes), jnp.float32),
    }


def vit_forward(x, params, *, patch_size, num_heads):
    B = x.shape[0]
    patches = extract_patches(x, patch_size)            # (B, N, C*P*P)
    _, N, CPP = patches.shape
    patches = patches.reshape(B * N, CPP)
    pos = params["pos"][0]                               # (S, D)
    S, D = pos.shape
    BS = B * S
    L = params["wqkv"].shape[0]
    M = params["w1"].shape[2]
    C = params["head_w"].shape[1]
    bf16 = jnp.bfloat16

    # Constants (fetched once; constant block index across the layer grid).
    const_inputs = (
        patches,
        params["patch_w"].astype(bf16), params["patch_b"],
        params["cls"], pos,
    )
    # Per-layer weights, streamed one layer per grid step (matrices in bf16).
    layer_inputs = (
        params["ln1_g"], params["ln1_b"],
        params["wqkv"].astype(bf16), params["bqkv"],
        params["wo"].astype(bf16), params["bo"],
        params["ln2_g"], params["ln2_b"],
        params["w1"].astype(bf16), params["b1"],
        params["w2"].astype(bf16), params["b2"],
    )
    tail_inputs = (
        params["cls_ln_g"], params["cls_ln_b"],
        params["head_w"].astype(bf16), params["head_b"],
    )
    inputs = const_inputs + layer_inputs + tail_inputs

    def _const_spec(a):
        z = (0,) * a.ndim
        return pl.BlockSpec(a.shape, lambda l, z=z: z)

    def _layer_spec(a):
        t = (0,) * (a.ndim - 1)
        return pl.BlockSpec((1,) + tuple(a.shape[1:]), lambda l, t=t: (l,) + t)

    in_specs = ([_const_spec(a) for a in const_inputs]
                + [_layer_spec(a) for a in layer_inputs]
                + [_const_spec(a) for a in tail_inputs])

    def _nbytes(a):
        return int(a.size) * int(jnp.dtype(a.dtype).itemsize)

    # VMEM budget: resident constants + double-buffered single-layer weights
    # + activation/ctx scratch + margin (capped to v7x's 64 MiB physical VMEM).
    const_bytes = sum(_nbytes(a) for a in const_inputs + tail_inputs)
    layer_bytes = sum(_nbytes(a) // L for a in layer_inputs)
    scratch_bytes = 2 * B * S * D * 4
    vmem_limit = const_bytes + 2 * layer_bytes + scratch_bytes + (8 << 20)
    vmem_limit = int(min(max(vmem_limit, 16 << 20), 64 << 20))

    # Advisory cost estimate for XLA's scheduler (per-batch attention flops).
    Dh = D // num_heads
    flops = 2 * B * N * CPP * D
    flops += L * (2 * BS * D * 3 * D + 2 * BS * D * D
                  + num_heads * 4 * B * S * S * Dh + 4 * BS * D * M)
    flops += 2 * B * D * C
    transcend = L * (num_heads * B * S * S + BS * M)
    bytes_acc = sum(_nbytes(a) for a in inputs) + B * C * 4

    kern = functools.partial(_vit_layer_kernel, B=B, S=S, H=num_heads)

    # TODO(synk): for v7x dual-TC, a leading 'parallel' batch grid axis would
    # shard batches across cores (at the cost of re-streaming weights per batch).
    return pl.pallas_call(
        kern,
        out_shape=jax.ShapeDtypeStruct((B, C), jnp.float32),
        grid=(L,),
        in_specs=in_specs,
        out_specs=pl.BlockSpec((B, C), lambda l: (0, 0)),
        scratch_shapes=[pltpu.VMEM((B, S, D), jnp.float32),   # activation slab
                        pltpu.VMEM((B, S, D), jnp.float32)],  # attention ctx
        compiler_params=pltpu.CompilerParams(
            dimension_semantics=("arbitrary",),
            vmem_limit_bytes=vmem_limit),
        cost_estimate=pl.CostEstimate(
            flops=int(flops), transcendentals=int(transcend),
            bytes_accessed=int(bytes_acc)),
    )(*inputs)


# --------------------------------- main ------------------------------------

if __name__ == "__main__":
    cfg = dict(img_size=16, in_channels=4, patch_size=8, num_layers=2,
               embedding_dim=32, mlp_size=64, num_heads=4, num_classes=10)

    key = jax.random.PRNGKey(0)
    pk, xk = jax.random.split(key)
    params = init_params(
        pk, img_size=cfg["img_size"], in_channels=cfg["in_channels"],
        patch_size=cfg["patch_size"], num_layers=cfg["num_layers"],
        embedding_dim=cfg["embedding_dim"], mlp_size=cfg["mlp_size"],
        num_classes=cfg["num_classes"])

    x = jax.random.normal(xk, (2, cfg["in_channels"], cfg["img_size"],
                               cfg["img_size"]), dtype=jnp.float32)   # NCHW

    fwd = jax.jit(functools.partial(vit_forward,
                                    patch_size=cfg["patch_size"],
                                    num_heads=cfg["num_heads"]))
    logits = fwd(x, params)
    jax.block_until_ready(logits)
    assert logits.shape == (2, cfg["num_classes"])
    print("KERNEL_OK")
</pallas_src>

<mosaic_0001>
module attributes {stable_mosaic.version = 11 : i64} {
  func.func @_vit_layer_kernel(%arg0: i32, %arg1: memref<8x256xf32, #tpu.memory_space<vmem>>, %arg2: memref<256x32xbf16, #tpu.memory_space<vmem>>, %arg3: memref<1x32xf32, #tpu.memory_space<vmem>>, %arg4: memref<1x32xf32, #tpu.memory_space<vmem>>, %arg5: memref<5x32xf32, #tpu.memory_space<vmem>>, %arg6: memref<1x1x32xf32, #tpu.memory_space<vmem>>, %arg7: memref<1x1x32xf32, #tpu.memory_space<vmem>>, %arg8: memref<1x32x96xbf16, #tpu.memory_space<vmem>>, %arg9: memref<1x1x96xf32, #tpu.memory_space<vmem>>, %arg10: memref<1x32x32xbf16, #tpu.memory_space<vmem>>, %arg11: memref<1x1x32xf32, #tpu.memory_space<vmem>>, %arg12: memref<1x1x32xf32, #tpu.memory_space<vmem>>, %arg13: memref<1x1x32xf32, #tpu.memory_space<vmem>>, %arg14: memref<1x32x64xbf16, #tpu.memory_space<vmem>>, %arg15: memref<1x1x64xf32, #tpu.memory_space<vmem>>, %arg16: memref<1x64x32xbf16, #tpu.memory_space<vmem>>, %arg17: memref<1x1x32xf32, #tpu.memory_space<vmem>>, %arg18: memref<1x32xf32, #tpu.memory_space<vmem>>, %arg19: memref<1x32xf32, #tpu.memory_space<vmem>>, %arg20: memref<32x10xbf16, #tpu.memory_space<vmem>>, %arg21: memref<1x10xf32, #tpu.memory_space<vmem>>, %arg22: memref<2x10xf32, #tpu.memory_space<vmem>>, %arg23: memref<2x5x32xf32, #tpu.memory_space<vmem>>, %arg24: memref<2x5x32xf32, #tpu.memory_space<vmem>>) attributes {dimension_semantics = [#tpu.dimension_semantics<arbitrary>], iteration_bounds = array<i64: 2>, scalar_prefetch = 0 : i64, scratch_operands = 2 : i64, tpu.core_type = #tpu.core_type<tc>, window_params = [{pipeline_mode = #tpu.pipeline_mode<synchronous>, transform_indices = @transform_0, window_bounds = array<i64: 8, 256>}, {pipeline_mode = #tpu.pipeline_mode<synchronous>, transform_indices = @transform_1, window_bounds = array<i64: 256, 32>}, {pipeline_mode = #tpu.pipeline_mode<synchronous>, transform_indices = @transform_2, window_bounds = array<i64: 1, 32>}, {pipeline_mode = #tpu.pipeline_mode<synchronous>, transform_indices = @transform_3, window_bounds = array<i64: 1, 32>}, {pipeline_mode = #tpu.pipeline_mode<synchronous>, transform_indices = @transform_4, window_bounds = array<i64: 5, 32>}, {transform_indices = @transform_5, window_bounds = array<i64: 1, 1, 32>}, {transform_indices = @transform_6, window_bounds = array<i64: 1, 1, 32>}, {transform_indices = @transform_7, window_bounds = array<i64: 1, 32, 96>}, {transform_indices = @transform_8, window_bounds = array<i64: 1, 1, 96>}, {transform_indices = @transform_9, window_bounds = array<i64: 1, 32, 32>}, {transform_indices = @transform_10, window_bounds = array<i64: 1, 1, 32>}, {transform_indices = @transform_11, window_bounds = array<i64: 1, 1, 32>}, {transform_indices = @transform_12, window_bounds = array<i64: 1, 1, 32>}, {transform_indices = @transform_13, window_bounds = array<i64: 1, 32, 64>}, {transform_indices = @transform_14, window_bounds = array<i64: 1, 1, 64>}, {transform_indices = @transform_15, window_bounds = array<i64: 1, 64, 32>}, {transform_indices = @transform_16, window_bounds = array<i64: 1, 1, 32>}, {pipeline_mode = #tpu.pipeline_mode<synchronous>, transform_indices = @transform_17, window_bounds = array<i64: 1, 32>}, {pipeline_mode = #tpu.pipeline_mode<synchronous>, transform_indices = @transform_18, window_bounds = array<i64: 1, 32>}, {pipeline_mode = #tpu.pipeline_mode<synchronous>, transform_indices = @transform_19, window_bounds = array<i64: 32, 10>}, {pipeline_mode = #tpu.pipeline_mode<synchronous>, transform_indices = @transform_20, window_bounds = array<i64: 1, 10>}, {pipeline_mode = #tpu.pipeline_mode<synchronous>, transform_indices = @transform_21, window_bounds = array<i64: 2, 10>}]} {
    %c0_i32 = arith.constant 0 : i32
    %0 = arith.cmpi eq, %arg0, %c0_i32 : i32
    %1 = arith.extui %0 : i1 to i32
    %c0_i32_0 = arith.constant 0 : i32
    %2 = arith.cmpi ne, %1, %c0_i32_0 : i32
    scf.if %2 {
      %c0_88 = arith.constant 0 : index
      %c0_89 = arith.constant 0 : index
      %198 = vector.load %arg1[%c0_88, %c0_89] : memref<8x256xf32, #tpu.memory_space<vmem>>, vector<8x256xf32>
      %199 = arith.truncf %198 : vector<8x256xf32> to vector<8x256xbf16>
      %c0_90 = arith.constant 0 : index
      %c0_91 = arith.constant 0 : index
      %200 = vector.load %arg2[%c0_90, %c0_91] : memref<256x32xbf16, #tpu.memory_space<vmem>>, vector<256x32xbf16>
      %cst_92 = arith.constant dense<0.000000e+00> : vector<8x32xf32>
      %201 = tpu.matmul %199, %200, %cst_92 {dimension_numbers = #tpu.dot_dimension_numbers<[1], [0], [0], [1], [0, 0, 1, 1], [], []>} : vector<8x256xbf16>, vector<256x32xbf16>, vector<8x32xf32> -> vector<8x32xf32>
      %c0_93 = arith.constant 0 : index
      %c0_94 = arith.constant 0 : index
      %202 = vector.load %arg3[%c0_93, %c0_94] : memref<1x32xf32, #tpu.memory_space<vmem>>, vector<1x32xf32>
      %203 = vector.broadcast %202 : vector<1x32xf32> to vector<8x32xf32>
      %204 = arith.addf %201, %203 : vector<8x32xf32>
      %c0_95 = arith.constant 0 : index
      %c0_96 = arith.constant 0 : index
      %205 = vector.load %arg4[%c0_95, %c0_96] : memref<1x32xf32, #tpu.memory_space<vmem>>, vector<1x32xf32>
      %c0_97 = arith.constant 0 : index
      %c0_98 = arith.constant 0 : index
      %206 = vector.load %arg5[%c0_97, %c0_98] : memref<5x32xf32, #tpu.memory_space<vmem>>, vector<1x32xf32>
      %207 = arith.addf %205, %206 : vector<1x32xf32>
      %208 = vector.shape_cast %207 : vector<1x32xf32> to vector<1x1x32xf32>
      %209 = vector.broadcast %208 : vector<1x1x32xf32> to vector<2x1x32xf32>
      %c0_99 = arith.constant 0 : index
      %c0_100 = arith.constant 0 : index
      %c0_101 = arith.constant 0 : index
      %210 = vector.load %arg23[%c0_99, %c0_100, %c0_101] : memref<2x5x32xf32, #tpu.memory_space<vmem>>, vector<2x1x32xf32>
      tpu.vector_store %arg23[%c0_99, %c0_100, %c0_101], %209 {strides = array<i32>} : memref<2x5x32xf32, #tpu.memory_space<vmem>>, vector<2x1x32xf32>,
      %211 = vector.shape_cast %204 : vector<8x32xf32> to vector<2x4x32xf32>
      %c1 = arith.constant 1 : index
      %c0_102 = arith.constant 0 : index
      %212 = vector.load %arg5[%c1, %c0_102] : memref<5x32xf32, #tpu.memory_space<vmem>>, vector<4x32xf32>
      %213 = vector.shape_cast %212 : vector<4x32xf32> to vector<1x4x32xf32>
      %214 = vector.broadcast %213 : vector<1x4x32xf32> to vector<2x4x32xf32>
      %215 = arith.addf %211, %214 : vector<2x4x32xf32>
      %c0_103 = arith.constant 0 : index
      %c1_104 = arith.constant 1 : index
      %c0_105 = arith.constant 0 : index
      %216 = vector.load %arg23[%c0_103, %c1_104, %c0_105] : memref<2x5x32xf32, #tpu.memory_space<vmem>>, vector<2x4x32xf32>
      tpu.vector_store %arg23[%c0_103, %c1_104, %c0_105], %215 {strides = array<i32>} : memref<2x5x32xf32, #tpu.memory_space<vmem>>, vector<2x4x32xf32>,
    } else {
    }
    %c0 = arith.constant 0 : index
    %c0_1 = arith.constant 0 : index
    %c0_2 = arith.constant 0 : index
    %3 = vector.load %arg23[%c0, %c0_1, %c0_2] : memref<2x5x32xf32, #tpu.memory_space<vmem>>, vector<2x5x32xf32>
    %c0_3 = arith.constant 0 : index
    %c0_4 = arith.constant 0 : index
    %c0_5 = arith.constant 0 : index
    %4 = vector.load %arg6[%c0_3, %c0_4, %c0_5] : memref<1x1x32xf32, #tpu.memory_space<vmem>>, vector<1x1x32xf32>
    %5 = vector.shape_cast %4 : vector<1x1x32xf32> to vector<1x32xf32>
    %c0_6 = arith.constant 0 : index
    %c0_7 = arith.constant 0 : index
    %c0_8 = arith.constant 0 : index
    %6 = vector.load %arg7[%c0_6, %c0_7, %c0_8] : memref<1x1x32xf32, #tpu.memory_space<vmem>>, vector<1x1x32xf32>
    %7 = vector.shape_cast %6 : vector<1x1x32xf32> to vector<1x32xf32>
    %cst = arith.constant dense<0.000000e+00> : vector<2x5xf32>
    %8 = vector.multi_reduction <add>, %3, %cst [2] : vector<2x5x32xf32> to vector<2x5xf32>
    %9 = vector.shape_cast %8 : vector<2x5xf32> to vector<2x5x1xf32>
    %cst_9 = arith.constant 3.200000e+01 : f32
    %10 = vector.broadcast %cst_9 : f32 to vector<2x5x1xf32>
    %11 = arith.divf %9, %10 : vector<2x5x1xf32>
    %12 = arith.mulf %3, %3 : vector<2x5x32xf32>
    %cst_10 = arith.constant dense<0.000000e+00> : vector<2x5xf32>
    %13 = vector.multi_reduction <add>, %12, %cst_10 [2] : vector<2x5x32xf32> to vector<2x5xf32>
    %14 = vector.shape_cast %13 : vector<2x5xf32> to vector<2x5x1xf32>
    %cst_11 = arith.constant 3.200000e+01 : f32
    %15 = vector.broadcast %cst_11 : f32 to vector<2x5x1xf32>
    %16 = arith.divf %14, %15 : vector<2x5x1xf32>
    %17 = arith.mulf %11, %11 : vector<2x5x1xf32>
    %18 = arith.subf %16, %17 : vector<2x5x1xf32>
    %19 = vector.broadcast %11 : vector<2x5x1xf32> to vector<2x5x32xf32>
    %20 = arith.subf %3, %19 : vector<2x5x32xf32>
    %cst_12 = arith.constant 9.99999974E-6 : f32
    %21 = vector.broadcast %cst_12 : f32 to vector<2x5x1xf32>
    %22 = arith.addf %18, %21 : vector<2x5x1xf32>
    %23 = math.rsqrt %22 : vector<2x5x1xf32>
    %24 = vector.broadcast %23 : vector<2x5x1xf32> to vector<2x5x32xf32>
    %25 = arith.mulf %20, %24 : vector<2x5x32xf32>
    %26 = vector.shape_cast %5 : vector<1x32xf32> to vector<1x1x32xf32>
    %27 = vector.broadcast %26 : vector<1x1x32xf32> to vector<2x5x32xf32>
    %28 = arith.mulf %25, %27 : vector<2x5x32xf32>
    %29 = vector.shape_cast %7 : vector<1x32xf32> to vector<1x1x32xf32>
    %30 = vector.broadcast %29 : vector<1x1x32xf32> to vector<2x5x32xf32>
    %31 = arith.addf %28, %30 : vector<2x5x32xf32>
    %32 = vector.shape_cast %31 : vector<2x5x32xf32> to vector<10x32xf32>
    %33 = arith.truncf %32 : vector<10x32xf32> to vector<10x32xbf16>
    %c0_13 = arith.constant 0 : index
    %c0_14 = arith.constant 0 : index
    %c0_15 = arith.constant 0 : index
    %34 = vector.load %arg8[%c0_13, %c0_14, %c0_15] : memref<1x32x96xbf16, #tpu.memory_space<vmem>>, vector<1x32x96xbf16>
    %35 = vector.shape_cast %34 : vector<1x32x96xbf16> to vector<32x96xbf16>
    %cst_16 = arith.constant dense<0.000000e+00> : vector<10x96xf32>
    %36 = tpu.matmul %33, %35, %cst_16 {dimension_numbers = #tpu.dot_dimension_numbers<[1], [0], [0], [1], [0, 0, 1, 1], [], []>} : vector<10x32xbf16>, vector<32x96xbf16>, vector<10x96xf32> -> vector<10x96xf32>
    %c0_17 = arith.constant 0 : index
    %c0_18 = arith.constant 0 : index
    %c0_19 = arith.constant 0 : index
    %37 = vector.load %arg9[%c0_17, %c0_18, %c0_19] : memref<1x1x96xf32, #tpu.memory_space<vmem>>, vector<1x1x96xf32>
    %38 = vector.shape_cast %37 : vector<1x1x96xf32> to vector<1x96xf32>
    %39 = vector.broadcast %38 : vector<1x96xf32> to vector<10x96xf32>
    %40 = arith.addf %36, %39 : vector<10x96xf32>
    %41 = vector.shape_cast %40 : vector<10x96xf32> to vector<2x5x96xf32>
    %42 = vector.extract_strided_slice %41 {offsets = [0, 0, 0], sizes = [2, 5, 32], strides = [1, 1, 1]} : vector<2x5x96xf32> to vector<2x5x32xf32>
    %cst_20 = arith.constant 0.353553385 : f32
    %43 = vector.broadcast %cst_20 : f32 to vector<2x5x32xf32>
    %44 = arith.mulf %42, %43 : vector<2x5x32xf32>
    %45 = vector.extract_strided_slice %41 {offsets = [0, 0, 32], sizes = [2, 5, 32], strides = [1, 1, 1]} : vector<2x5x96xf32> to vector<2x5x32xf32>
    %46 = vector.extract_strided_slice %41 {offsets = [0, 0, 64], sizes = [2, 5, 32], strides = [1, 1, 1]} : vector<2x5x96xf32> to vector<2x5x32xf32>
    %47 = vector.extract_strided_slice %44 {offsets = [0, 0, 0], sizes = [2, 5, 8], strides = [1, 1, 1]} : vector<2x5x32xf32> to vector<2x5x8xf32>
    %48 = arith.truncf %47 : vector<2x5x8xf32> to vector<2x5x8xbf16>
    %49 = vector.extract_strided_slice %45 {offsets = [0, 0, 0], sizes = [2, 5, 8], strides = [1, 1, 1]} : vector<2x5x32xf32> to vector<2x5x8xf32>
    %50 = arith.truncf %49 : vector<2x5x8xf32> to vector<2x5x8xbf16>
    %51 = vector.extract_strided_slice %46 {offsets = [0, 0, 0], sizes = [2, 5, 8], strides = [1, 1, 1]} : vector<2x5x32xf32> to vector<2x5x8xf32>
    %52 = arith.truncf %51 : vector<2x5x8xf32> to vector<2x5x8xbf16>
    "tpu.trace_start"() <{level = 10 : i32, message = "bqd,bkd->bqk"}> : () -> ()
    %cst_21 = arith.constant dense<0.000000e+00> : vector<2x5x5xf32>
    %53 = tpu.matmul %48, %50, %cst_21 {dimension_numbers = #tpu.dot_dimension_numbers<[2], [2], [1], [1], [0, 0, 0, 1, 1, 1], [0], [0]>} : vector<2x5x8xbf16>, vector<2x5x8xbf16>, vector<2x5x5xf32> -> vector<2x5x5xf32>
    "tpu.trace_stop"() : () -> ()
    %cst_22 = arith.constant dense<0xFF800000> : vector<2x5xf32>
    %54 = vector.multi_reduction <maximumf>, %53, %cst_22 [2] : vector<2x5x5xf32> to vector<2x5xf32>
    %55 = vector.shape_cast %54 : vector<2x5xf32> to vector<2x5x1xf32>
    %56 = vector.broadcast %55 : vector<2x5x1xf32> to vector<2x5x5xf32>
    %57 = arith.subf %53, %56 : vector<2x5x5xf32>
    %58 = math.exp %57 : vector<2x5x5xf32>
    %cst_23 = arith.constant dense<0.000000e+00> : vector<2x5xf32>
    %59 = vector.multi_reduction <add>, %58, %cst_23 [2] : vector<2x5x5xf32> to vector<2x5xf32>
    %60 = vector.shape_cast %59 : vector<2x5xf32> to vector<2x5x1xf32>
    %61 = tpu.reciprocal %60 {approx = true} : vector<2x5x1xf32> -> vector<2x5x1xf32>
    %62 = vector.broadcast %61 : vector<2x5x1xf32> to vector<2x5x5xf32>
    %63 = arith.mulf %58, %62 : vector<2x5x5xf32>
    %64 = arith.truncf %63 : vector<2x5x5xf32> to vector<2x5x5xbf16>
    "tpu.trace_start"() <{level = 10 : i32, message = "bqk,bkd->bqd"}> : () -> ()
    %cst_24 = arith.constant dense<0.000000e+00> : vector<2x5x8xf32>
    %65 = tpu.matmul %64, %52, %cst_24 {dimension_numbers = #tpu.dot_dimension_numbers<[2], [1], [1], [2], [0, 0, 0, 1, 1, 2], [0], [0]>} : vector<2x5x5xbf16>, vector<2x5x8xbf16>, vector<2x5x8xf32> -> vector<2x5x8xf32>
    "tpu.trace_stop"() : () -> ()
    %c0_25 = arith.constant 0 : index
    %c0_26 = arith.constant 0 : index
    %c0_27 = arith.constant 0 : index
    %66 = vector.load %arg24[%c0_25, %c0_26, %c0_27] : memref<2x5x32xf32, #tpu.memory_space<vmem>>, vector<2x5x8xf32>
    tpu.vector_store %arg24[%c0_25, %c0_26, %c0_27], %65 {strides = array<i32>} : memref<2x5x32xf32, #tpu.memory_space<vmem>>, vector<2x5x8xf32>,
    %67 = vector.extract_strided_slice %44 {offsets = [0, 0, 8], sizes = [2, 5, 8], strides = [1, 1, 1]} : vector<2x5x32xf32> to vector<2x5x8xf32>
    %68 = arith.truncf %67 : vector<2x5x8xf32> to vector<2x5x8xbf16>
    %69 = vector.extract_strided_slice %45 {offsets = [0, 0, 8], sizes = [2, 5, 8], strides = [1, 1, 1]} : vector<2x5x32xf32> to vector<2x5x8xf32>
    %70 = arith.truncf %69 : vector<2x5x8xf32> to vector<2x5x8xbf16>
    %71 = vector.extract_strided_slice %46 {offsets = [0, 0, 8], sizes = [2, 5, 8], strides = [1, 1, 1]} : vector<2x5x32xf32> to vector<2x5x8xf32>
    %72 = arith.truncf %71 : vector<2x5x8xf32> to vector<2x5x8xbf16>
    "tpu.trace_start"() <{level = 10 : i32, message = "bqd,bkd->bqk"}> : () -> ()
    %cst_28 = arith.constant dense<0.000000e+00> : vector<2x5x5xf32>
    %73 = tpu.matmul %68, %70, %cst_28 {dimension_numbers = #tpu.dot_dimension_numbers<[2], [2], [1], [1], [0, 0, 0, 1, 1, 1], [0], [0]>} : vector<2x5x8xbf16>, vector<2x5x8xbf16>, vector<2x5x5xf32> -> vector<2x5x5xf32>
    "tpu.trace_stop"() : () -> ()
    %cst_29 = arith.constant dense<0xFF800000> : vector<2x5xf32>
    %74 = vector.multi_reduction <maximumf>, %73, %cst_29 [2] : vector<2x5x5xf32> to vector<2x5xf32>
    %75 = vector.shape_cast %74 : vector<2x5xf32> to vector<2x5x1xf32>
    %76 = vector.broadcast %75 : vector<2x5x1xf32> to vector<2x5x5xf32>
    %77 = arith.subf %73, %76 : vector<2x5x5xf32>
    %78 = math.exp %77 : vector<2x5x5xf32>
    %cst_30 = arith.constant dense<0.000000e+00> : vector<2x5xf32>
    %79 = vector.multi_reduction <add>, %78, %cst_30 [2] : vector<2x5x5xf32> to vector<2x5xf32>
    %80 = vector.shape_cast %79 : vector<2x5xf32> to vector<2x5x1xf32>
    %81 = tpu.reciprocal %80 {approx = true} : vector<2x5x1xf32> -> vector<2x5x1xf32>
    %82 = vector.broadcast %81 : vector<2x5x1xf32> to vector<2x5x5xf32>
    %83 = arith.mulf %78, %82 : vector<2x5x5xf32>
    %84 = arith.truncf %83 : vector<2x5x5xf32> to vector<2x5x5xbf16>
    "tpu.trace_start"() <{level = 10 : i32, message = "bqk,bkd->bqd"}> : () -> ()
    %cst_31 = arith.constant dense<0.000000e+00> : vector<2x5x8xf32>
    %85 = tpu.matmul %84, %72, %cst_31 {dimension_numbers = #tpu.dot_dimension_numbers<[2], [1], [1], [2], [0, 0, 0, 1, 1, 2], [0], [0]>} : vector<2x5x5xbf16>, vector<2x5x8xbf16>, vector<2x5x8xf32> -> vector<2x5x8xf32>
    "tpu.trace_stop"() : () -> ()
    %c0_32 = arith.constant 0 : index
    %c0_33 = arith.constant 0 : index
    %c8 = arith.constant 8 : index
    %86 = vector.load %arg24[%c0_32, %c0_33, %c8] : memref<2x5x32xf32, #tpu.memory_space<vmem>>, vector<2x5x8xf32>
    tpu.vector_store %arg24[%c0_32, %c0_33, %c8], %85 {strides = array<i32>} : memref<2x5x32xf32, #tpu.memory_space<vmem>>, vector<2x5x8xf32>,
    %87 = vector.extract_strided_slice %44 {offsets = [0, 0, 16], sizes = [2, 5, 8], strides = [1, 1, 1]} : vector<2x5x32xf32> to vector<2x5x8xf32>
    %88 = arith.truncf %87 : vector<2x5x8xf32> to vector<2x5x8xbf16>
    %89 = vector.extract_strided_slice %45 {offsets = [0, 0, 16], sizes = [2, 5, 8], strides = [1, 1, 1]} : vector<2x5x32xf32> to vector<2x5x8xf32>
    %90 = arith.truncf %89 : vector<2x5x8xf32> to vector<2x5x8xbf16>
    %91 = vector.extract_strided_slice %46 {offsets = [0, 0, 16], sizes = [2, 5, 8], strides = [1, 1, 1]} : vector<2x5x32xf32> to vector<2x5x8xf32>
    %92 = arith.truncf %91 : vector<2x5x8xf32> to vector<2x5x8xbf16>
    "tpu.trace_start"() <{level = 10 : i32, message = "bqd,bkd->bqk"}> : () -> ()
    %cst_34 = arith.constant dense<0.000000e+00> : vector<2x5x5xf32>
    %93 = tpu.matmul %88, %90, %cst_34 {dimension_numbers = #tpu.dot_dimension_numbers<[2], [2], [1], [1], [0, 0, 0, 1, 1, 1], [0], [0]>} : vector<2x5x8xbf16>, vector<2x5x8xbf16>, vector<2x5x5xf32> -> vector<2x5x5xf32>
    "tpu.trace_stop"() : () -> ()
    %cst_35 = arith.constant dense<0xFF800000> : vector<2x5xf32>
    %94 = vector.multi_reduction <maximumf>, %93, %cst_35 [2] : vector<2x5x5xf32> to vector<2x5xf32>
    %95 = vector.shape_cast %94 : vector<2x5xf32> to vector<2x5x1xf32>
    %96 = vector.broadcast %95 : vector<2x5x1xf32> to vector<2x5x5xf32>
    %97 = arith.subf %93, %96 : vector<2x5x5xf32>
    %98 = math.exp %97 : vector<2x5x5xf32>
    %cst_36 = arith.constant dense<0.000000e+00> : vector<2x5xf32>
    %99 = vector.multi_reduction <add>, %98, %cst_36 [2] : vector<2x5x5xf32> to vector<2x5xf32>
    %100 = vector.shape_cast %99 : vector<2x5xf32> to vector<2x5x1xf32>
    %101 = tpu.reciprocal %100 {approx = true} : vector<2x5x1xf32> -> vector<2x5x1xf32>
    %102 = vector.broadcast %101 : vector<2x5x1xf32> to vector<2x5x5xf32>
    %103 = arith.mulf %98, %102 : vector<2x5x5xf32>
    %104 = arith.truncf %103 : vector<2x5x5xf32> to vector<2x5x5xbf16>
    "tpu.trace_start"() <{level = 10 : i32, message = "bqk,bkd->bqd"}> : () -> ()
    %cst_37 = arith.constant dense<0.000000e+00> : vector<2x5x8xf32>
    %105 = tpu.matmul %104, %92, %cst_37 {dimension_numbers = #tpu.dot_dimension_numbers<[2], [1], [1], [2], [0, 0, 0, 1, 1, 2], [0], [0]>} : vector<2x5x5xbf16>, vector<2x5x8xbf16>, vector<2x5x8xf32> -> vector<2x5x8xf32>
    "tpu.trace_stop"() : () -> ()
    %c0_38 = arith.constant 0 : index
    %c0_39 = arith.constant 0 : index
    %c16 = arith.constant 16 : index
    %106 = vector.load %arg24[%c0_38, %c0_39, %c16] : memref<2x5x32xf32, #tpu.memory_space<vmem>>, vector<2x5x8xf32>
    tpu.vector_store %arg24[%c0_38, %c0_39, %c16], %105 {strides = array<i32>} : memref<2x5x32xf32, #tpu.memory_space<vmem>>, vector<2x5x8xf32>,
    %107 = vector.extract_strided_slice %44 {offsets = [0, 0, 24], sizes = [2, 5, 8], strides = [1, 1, 1]} : vector<2x5x32xf32> to vector<2x5x8xf32>
    %108 = arith.truncf %107 : vector<2x5x8xf32> to vector<2x5x8xbf16>
    %109 = vector.extract_strided_slice %45 {offsets = [0, 0, 24], sizes = [2, 5, 8], strides = [1, 1, 1]} : vector<2x5x32xf32> to vector<2x5x8xf32>
    %110 = arith.truncf %109 : vector<2x5x8xf32> to vector<2x5x8xbf16>
    %111 = vector.extract_strided_slice %46 {offsets = [0, 0, 24], sizes = [2, 5, 8], strides = [1, 1, 1]} : vector<2x5x32xf32> to vector<2x5x8xf32>
    %112 = arith.truncf %111 : vector<2x5x8xf32> to vector<2x5x8xbf16>
    "tpu.trace_start"() <{level = 10 : i32, message = "bqd,bkd->bqk"}> : () -> ()
    %cst_40 = arith.constant dense<0.000000e+00> : vector<2x5x5xf32>
    %113 = tpu.matmul %108, %110, %cst_40 {dimension_numbers = #tpu.dot_dimension_numbers<[2], [2], [1], [1], [0, 0, 0, 1, 1, 1], [0], [0]>} : vector<2x5x8xbf16>, vector<2x5x8xbf16>, vector<2x5x5xf32> -> vector<2x5x5xf32>
    "tpu.trace_stop"() : () -> ()
    %cst_41 = arith.constant dense<0xFF800000> : vector<2x5xf32>
    %114 = vector.multi_reduction <maximumf>, %113, %cst_41 [2] : vector<2x5x5xf32> to vector<2x5xf32>
    %115 = vector.shape_cast %114 : vector<2x5xf32> to vector<2x5x1xf32>
    %116 = vector.broadcast %115 : vector<2x5x1xf32> to vector<2x5x5xf32>
    %117 = arith.subf %113, %116 : vector<2x5x5xf32>
    %118 = math.exp %117 : vector<2x5x5xf32>
    %cst_42 = arith.constant dense<0.000000e+00> : vector<2x5xf32>
    %119 = vector.multi_reduction <add>, %118, %cst_42 [2] : vector<2x5x5xf32> to vector<2x5xf32>
    %120 = vector.shape_cast %119 : vector<2x5xf32> to vector<2x5x1xf32>
    %121 = tpu.reciprocal %120 {approx = true} : vector<2x5x1xf32> -> vector<2x5x1xf32>
    %122 = vector.broadcast %121 : vector<2x5x1xf32> to vector<2x5x5xf32>
    %123 = arith.mulf %118, %122 : vector<2x5x5xf32>
    %124 = arith.truncf %123 : vector<2x5x5xf32> to vector<2x5x5xbf16>
    "tpu.trace_start"() <{level = 10 : i32, message = "bqk,bkd->bqd"}> : () -> ()
    %cst_43 = arith.constant dense<0.000000e+00> : vector<2x5x8xf32>
    %125 = tpu.matmul %124, %112, %cst_43 {dimension_numbers = #tpu.dot_dimension_numbers<[2], [1], [1], [2], [0, 0, 0, 1, 1, 2], [0], [0]>} : vector<2x5x5xbf16>, vector<2x5x8xbf16>, vector<2x5x8xf32> -> vector<2x5x8xf32>
    "tpu.trace_stop"() : () -> ()
    %c0_44 = arith.constant 0 : index
    %c0_45 = arith.constant 0 : index
    %c24 = arith.constant 24 : index
    %126 = vector.load %arg24[%c0_44, %c0_45, %c24] : memref<2x5x32xf32, #tpu.memory_space<vmem>>, vector<2x5x8xf32>
    tpu.vector_store %arg24[%c0_44, %c0_45, %c24], %125 {strides = array<i32>} : memref<2x5x32xf32, #tpu.memory_space<vmem>>, vector<2x5x8xf32>,
    %c0_46 = arith.constant 0 : index
    %c0_47 = arith.constant 0 : index
    %c0_48 = arith.constant 0 : index
    %127 = vector.load %arg24[%c0_46, %c0_47, %c0_48] : memref<2x5x32xf32, #tpu.memory_space<vmem>>, vector<2x5x32xf32>
    %128 = vector.shape_cast %127 : vector<2x5x32xf32> to vector<10x32xf32>
    %129 = arith.truncf %128 : vector<10x32xf32> to vector<10x32xbf16>
    %c0_49 = arith.constant 0 : index
    %c0_50 = arith.constant 0 : index
    %c0_51 = arith.constant 0 : index
    %130 = vector.load %arg10[%c0_49, %c0_50, %c0_51] : memref<1x32x32xbf16, #tpu.memory_space<vmem>>, vector<1x32x32xbf16>
    %131 = vector.shape_cast %130 : vector<1x32x32xbf16> to vector<32x32xbf16>
    %cst_52 = arith.constant dense<0.000000e+00> : vector<10x32xf32>
    %132 = tpu.matmul %129, %131, %cst_52 {dimension_numbers = #tpu.dot_dimension_numbers<[1], [0], [0], [1], [0, 0, 1, 1], [], []>} : vector<10x32xbf16>, vector<32x32xbf16>, vector<10x32xf32> -> vector<10x32xf32>
    %c0_53 = arith.constant 0 : index
    %c0_54 = arith.constant 0 : index
    %c0_55 = arith.constant 0 : index
    %133 = vector.load %arg11[%c0_53, %c0_54, %c0_55] : memref<1x1x32xf32, #tpu.memory_space<vmem>>, vector<1x1x32xf32>
    %134 = vector.shape_cast %133 : vector<1x1x32xf32> to vector<1x32xf32>
    %135 = vector.broadcast %134 : vector<1x32xf32> to vector<10x32xf32>
    %136 = arith.addf %132, %135 : vector<10x32xf32>
    %137 = vector.shape_cast %136 : vector<10x32xf32> to vector<2x5x32xf32>
    %138 = arith.addf %3, %137 : vector<2x5x32xf32>
    %c0_56 = arith.constant 0 : index
    %c0_57 = arith.constant 0 : index
    %c0_58 = arith.constant 0 : index
    %139 = vector.load %arg12[%c0_56, %c0_57, %c0_58] : memref<1x1x32xf32, #tpu.memory_space<vmem>>, vector<1x1x32xf32>
    %140 = vector.shape_cast %139 : vector<1x1x32xf32> to vector<1x32xf32>
    %c0_59 = arith.constant 0 : index
    %c0_60 = arith.constant 0 : index
    %c0_61 = arith.constant 0 : index
    %141 = vector.load %arg13[%c0_59, %c0_60, %c0_61] : memref<1x1x32xf32, #tpu.memory_space<vmem>>, vector<1x1x32xf32>
    %142 = vector.shape_cast %141 : vector<1x1x32xf32> to vector<1x32xf32>
    %cst_62 = arith.constant dense<0.000000e+00> : vector<2x5xf32>
    %143 = vector.multi_reduction <add>, %138, %cst_62 [2] : vector<2x5x32xf32> to vector<2x5xf32>
    %144 = vector.shape_cast %143 : vector<2x5xf32> to vector<2x5x1xf32>
    %cst_63 = arith.constant 3.200000e+01 : f32
    %145 = vector.broadcast %cst_63 : f32 to vector<2x5x1xf32>
    %146 = arith.divf %144, %145 : vector<2x5x1xf32>
    %147 = arith.mulf %138, %138 : vector<2x5x32xf32>
    %cst_64 = arith.constant dense<0.000000e+00> : vector<2x5xf32>
    %148 = vector.multi_reduction <add>, %147, %cst_64 [2] : vector<2x5x32xf32> to vector<2x5xf32>
    %149 = vector.shape_cast %148 : vector<2x5xf32> to vector<2x5x1xf32>
    %cst_65 = arith.constant 3.200000e+01 : f32
    %150 = vector.broadcast %cst_65 : f32 to vector<2x5x1xf32>
    %151 = arith.divf %149, %150 : vector<2x5x1xf32>
    %152 = arith.mulf %146, %146 : vector<2x5x1xf32>
    %153 = arith.subf %151, %152 : vector<2x5x1xf32>
    %154 = vector.broadcast %146 : vector<2x5x1xf32> to vector<2x5x32xf32>
    %155 = arith.subf %138, %154 : vector<2x5x32xf32>
    %cst_66 = arith.constant 9.99999974E-6 : f32
    %156 = vector.broadcast %cst_66 : f32 to vector<2x5x1xf32>
    %157 = arith.addf %153, %156 : vector<2x5x1xf32>
    %158 = math.rsqrt %157 : vector<2x5x1xf32>
    %159 = vector.broadcast %158 : vector<2x5x1xf32> to vector<2x5x32xf32>
    %160 = arith.mulf %155, %159 : vector<2x5x32xf32>
    %161 = vector.shape_cast %140 : vector<1x32xf32> to vector<1x1x32xf32>
    %162 = vector.broadcast %161 : vector<1x1x32xf32> to vector<2x5x32xf32>
    %163 = arith.mulf %160, %162 : vector<2x5x32xf32>
    %164 = vector.shape_cast %142 : vector<1x32xf32> to vector<1x1x32xf32>
    %165 = vector.broadcast %164 : vector<1x1x32xf32> to vector<2x5x32xf32>
    %166 = arith.addf %163, %165 : vector<2x5x32xf32>
    %167 = vector.shape_cast %166 : vector<2x5x32xf32> to vector<10x32xf32>
    %168 = arith.truncf %167 : vector<10x32xf32> to vector<10x32xbf16>
    %c0_67 = arith.constant 0 : index
    %c0_68 = arith.constant 0 : index
    %c0_69 = arith.constant 0 : index
    %169 = vector.load %arg14[%c0_67, %c0_68, %c0_69] : memref<1x32x64xbf16, #tpu.memory_space<vmem>>, vector<1x32x64xbf16>
    %170 = vector.shape_cast %169 : vector<1x32x64xbf16> to vector<32x64xbf16>
    %cst_70 = arith.constant dense<0.000000e+00> : vector<10x64xf32>
    %171 = tpu.matmul %168, %170, %cst_70 {dimension_numbers = #tpu.dot_dimension_numbers<[1], [0], [0], [1], [0, 0, 1, 1], [], []>} : vector<10x32xbf16>, vector<32x64xbf16>, vector<10x64xf32> -> vector<10x64xf32>
    %c0_71 = arith.constant 0 : index
    %c0_72 = arith.constant 0 : index
    %c0_73 = arith.constant 0 : index
    %172 = vector.load %arg15[%c0_71, %c0_72, %c0_73] : memref<1x1x64xf32, #tpu.memory_space<vmem>>, vector<1x1x64xf32>
    %173 = vector.shape_cast %172 : vector<1x1x64xf32> to vector<1x64xf32>
    %174 = vector.broadcast %173 : vector<1x64xf32> to vector<10x64xf32>
    %175 = arith.addf %171, %174 : vector<10x64xf32>
    %cst_74 = arith.constant 5.000000e-01 : f32
    %176 = vector.broadcast %cst_74 : f32 to vector<10x64xf32>
    %177 = arith.mulf %176, %175 : vector<10x64xf32>
    %cst_75 = arith.constant 0.707106769 : f32
    %178 = vector.broadcast %cst_75 : f32 to vector<10x64xf32>
    %179 = arith.mulf %175, %178 : vector<10x64xf32>
    %180 = math.erf %179 : vector<10x64xf32>
    %cst_76 = arith.constant 1.000000e+00 : f32
    %181 = vector.broadcast %cst_76 : f32 to vector<10x64xf32>
    %182 = arith.addf %181, %180 : vector<10x64xf32>
    %183 = arith.mulf %177, %182 : vector<10x64xf32>
    %184 = arith.truncf %183 : vector<10x64xf32> to vector<10x64xbf16>
    %c0_77 = arith.constant 0 : index
    %c0_78 = arith.constant 0 : index
    %c0_79 = arith.constant 0 : index
    %185 = vector.load %arg16[%c0_77, %c0_78, %c0_79] : memref<1x64x32xbf16, #tpu.memory_space<vmem>>, vector<1x64x32xbf16>
    %186 = vector.shape_cast %185 : vector<1x64x32xbf16> to vector<64x32xbf16>
    %cst_80 = arith.constant dense<0.000000e+00> : vector<10x32xf32>
    %187 = tpu.matmul %184, %186, %cst_80 {dimension_numbers = #tpu.dot_dimension_numbers<[1], [0], [0], [1], [0, 0, 1, 1], [], []>} : vector<10x64xbf16>, vector<64x32xbf16>, vector<10x32xf32> -> vector<10x32xf32>
    %c0_81 = arith.constant 0 : index
    %c0_82 = arith.constant 0 : index
    %c0_83 = arith.constant 0 : index
    %188 = vector.load %arg17[%c0_81, %c0_82, %c0_83] : memref<1x1x32xf32, #tpu.memory_space<vmem>>, vector<1x1x32xf32>
    %189 = vector.shape_cast %188 : vector<1x1x32xf32> to vector<1x32xf32>
    %190 = vector.broadcast %189 : vector<1x32xf32> to vector<10x32xf32>
    %191 = arith.addf %187, %190 : vector<10x32xf32>
    %192 = vector.shape_cast %191 : vector<10x32xf32> to vector<2x5x32xf32>
    %193 = arith.addf %138, %192 : vector<2x5x32xf32>
    %c0_84 = arith.constant 0 : index
    %c0_85 = arith.constant 0 : index
    %c0_86 = arith.constant 0 : index
    %194 = vector.load %arg23[%c0_84, %c0_85, %c0_86] : memref<2x5x32xf32, #tpu.memory_space<vmem>>, vector<2x5x32xf32>
    tpu.vector_store %arg23[%c0_84, %c0_85, %c0_86], %193 {strides = array<i32>} : memref<2x5x32xf32, #tpu.memory_space<vmem>>, vector<2x5x32xf32>,
    %c1_i32 = arith.constant 1 : i32
    %195 = arith.cmpi eq, %arg0, %c1_i32 : i32
    %196 = arith.extui %195 : i1 to i32
    %c0_i32_87 = arith.constant 0 : i32
    %197 = arith.cmpi ne, %196, %c0_i32_87 : i32
    scf.if %197 {
      %198 = vector.extract_strided_slice %193 {offsets = [0, 0, 0], sizes = [2, 1, 32], strides = [1, 1, 1]} : vector<2x5x32xf32> to vector<2x1x32xf32>
      %199 = vector.shape_cast %198 : vector<2x1x32xf32> to vector<2x32xf32>
      %c0_88 = arith.constant 0 : index
      %c0_89 = arith.constant 0 : index
      %200 = vector.load %arg18[%c0_88, %c0_89] : memref<1x32xf32, #tpu.memory_space<vmem>>, vector<1x32xf32>
      %c0_90 = arith.constant 0 : index
      %c0_91 = arith.constant 0 : index
      %201 = vector.load %arg19[%c0_90, %c0_91] : memref<1x32xf32, #tpu.memory_space<vmem>>, vector<1x32xf32>
      %cst_92 = arith.constant dense<0.000000e+00> : vector<2xf32>
      %202 = vector.multi_reduction <add>, %199, %cst_92 [1] : vector<2x32xf32> to vector<2xf32>
      %203 = vector.shape_cast %202 : vector<2xf32> to vector<2x1xf32>
      %cst_93 = arith.constant 3.200000e+01 : f32
      %204 = vector.broadcast %cst_93 : f32 to vector<2x1xf32>
      %205 = arith.divf %203, %204 : vector<2x1xf32>
      %206 = arith.mulf %199, %199 : vector<2x32xf32>
      %cst_94 = arith.constant dense<0.000000e+00> : vector<2xf32>
      %207 = vector.multi_reduction <add>, %206, %cst_94 [1] : vector<2x32xf32> to vector<2xf32>
      %208 = vector.shape_cast %207 : vector<2xf32> to vector<2x1xf32>
      %cst_95 = arith.constant 3.200000e+01 : f32
      %209 = vector.broadcast %cst_95 : f32 to vector<2x1xf32>
      %210 = arith.divf %208, %209 : vector<2x1xf32>
      %211 = arith.mulf %205, %205 : vector<2x1xf32>
      %212 = arith.subf %210, %211 : vector<2x1xf32>
      %213 = vector.broadcast %205 : vector<2x1xf32> to vector<2x32xf32>
      %214 = arith.subf %199, %213 : vector<2x32xf32>
      %cst_96 = arith.constant 9.99999974E-6 : f32
      %215 = vector.broadcast %cst_96 : f32 to vector<2x1xf32>
      %216 = arith.addf %212, %215 : vector<2x1xf32>
      %217 = math.rsqrt %216 : vector<2x1xf32>
      %218 = vector.broadcast %217 : vector<2x1xf32> to vector<2x32xf32>
      %219 = arith.mulf %214, %218 : vector<2x32xf32>
      %220 = vector.broadcast %200 : vector<1x32xf32> to vector<2x32xf32>
      %221 = arith.mulf %219, %220 : vector<2x32xf32>
      %222 = vector.broadcast %201 : vector<1x32xf32> to vector<2x32xf32>
      %223 = arith.addf %221, %222 : vector<2x32xf32>
      %224 = arith.truncf %223 : vector<2x32xf32> to vector<2x32xbf16>
      %c0_97 = arith.constant 0 : index
      %c0_98 = arith.constant 0 : index
      %225 = vector.load %arg20[%c0_97, %c0_98] : memref<32x10xbf16, #tpu.memory_space<vmem>>, vector<32x10xbf16>
      %cst_99 = arith.constant dense<0.000000e+00> : vector<2x10xf32>
      %226 = tpu.matmul %224, %225, %cst_99 {dimension_numbers = #tpu.dot_dimension_numbers<[1], [0], [0], [1], [0, 0, 1, 1], [], []>} : vector<2x32xbf16>, vector<32x10xbf16>, vector<2x10xf32> -> vector<2x10xf32>
      %c0_100 = arith.constant 0 : index
      %c0_101 = arith.constant 0 : index
      %227 = vector.load %arg21[%c0_100, %c0_101] : memref<1x10xf32, #tpu.memory_space<vmem>>, vector<1x10xf32>
      %228 = vector.broadcast %227 : vector<1x10xf32> to vector<2x10xf32>
      %229 = arith.addf %226, %228 : vector<2x10xf32>
      %c0_102 = arith.constant 0 : index
      %c0_103 = arith.constant 0 : index
      %230 = vector.load %arg22[%c0_102, %c0_103] : memref<2x10xf32, #tpu.memory_space<vmem>>, vector<2x10xf32>
      tpu.vector_store %arg22[%c0_102, %c0_103], %229 {strides = array<i32>} : memref<2x10xf32, #tpu.memory_space<vmem>>, vector<2x10xf32>,
    } else {
    }
    return
  }
  func.func @transform_0(%arg0: i32) -> (i32, i32) {
    %c0_i32 = arith.constant 0 : i32
    %c0_i32_0 = arith.constant 0 : i32
    %c0_i32_1 = arith.constant 0 : i32
    return %c0_i32, %c0_i32_0 : i32, i32
  }
  func.func @transform_1(%arg0: i32) -> (i32, i32) {
    %c0_i32 = arith.constant 0 : i32
    %c0_i32_0 = arith.constant 0 : i32
    %c0_i32_1 = arith.constant 0 : i32
    return %c0_i32, %c0_i32_0 : i32, i32
  }
  func.func @transform_2(%arg0: i32) -> (i32, i32) {
    %c0_i32 = arith.constant 0 : i32
    %c0_i32_0 = arith.constant 0 : i32
    %c0_i32_1 = arith.constant 0 : i32
    return %c0_i32, %c0_i32_0 : i32, i32
  }
  func.func @transform_3(%arg0: i32) -> (i32, i32) {
    %c0_i32 = arith.constant 0 : i32
    %c0_i32_0 = arith.constant 0 : i32
    %c0_i32_1 = arith.constant 0 : i32
    return %c0_i32, %c0_i32_0 : i32, i32
  }
  func.func @transform_4(%arg0: i32) -> (i32, i32) {
    %c0_i32 = arith.constant 0 : i32
    %c0_i32_0 = arith.constant 0 : i32
    %c0_i32_1 = arith.constant 0 : i32
    return %c0_i32, %c0_i32_0 : i32, i32
  }
  func.func @transform_5(%arg0: i32) -> (i32, i32, i32) {
    %c0_i32 = arith.constant 0 : i32
    %c0_i32_0 = arith.constant 0 : i32
    %c0_i32_1 = arith.constant 0 : i32
    return %arg0, %c0_i32, %c0_i32_0 : i32, i32, i32
  }
  func.func @transform_6(%arg0: i32) -> (i32, i32, i32) {
    %c0_i32 = arith.constant 0 : i32
    %c0_i32_0 = arith.constant 0 : i32
    %c0_i32_1 = arith.constant 0 : i32
    return %arg0, %c0_i32, %c0_i32_0 : i32, i32, i32
  }
  func.func @transform_7(%arg0: i32) -> (i32, i32, i32) {
    %c0_i32 = arith.constant 0 : i32
    %c0_i32_0 = arith.constant 0 : i32
    %c0_i32_1 = arith.constant 0 : i32
    return %arg0, %c0_i32, %c0_i32_0 : i32, i32, i32
  }
  func.func @transform_8(%arg0: i32) -> (i32, i32, i32) {
    %c0_i32 = arith.constant 0 : i32
    %c0_i32_0 = arith.constant 0 : i32
    %c0_i32_1 = arith.constant 0 : i32
    return %arg0, %c0_i32, %c0_i32_0 : i32, i32, i32
  }
  func.func @transform_9(%arg0: i32) -> (i32, i32, i32) {
    %c0_i32 = arith.constant 0 : i32
    %c0_i32_0 = arith.constant 0 : i32
    %c0_i32_1 = arith.constant 0 : i32
    return %arg0, %c0_i32, %c0_i32_0 : i32, i32, i32
  }
  func.func @transform_10(%arg0: i32) -> (i32, i32, i32) {
    %c0_i32 = arith.constant 0 : i32
    %c0_i32_0 = arith.constant 0 : i32
    %c0_i32_1 = arith.constant 0 : i32
    return %arg0, %c0_i32, %c0_i32_0 : i32, i32, i32
  }
  func.func @transform_11(%arg0: i32) -> (i32, i32, i32) {
    %c0_i32 = arith.constant 0 : i32
    %c0_i32_0 = arith.constant 0 : i32
    %c0_i32_1 = arith.constant 0 : i32
    return %arg0, %c0_i32, %c0_i32_0 : i32, i32, i32
  }
  func.func @transform_12(%arg0: i32) -> (i32, i32, i32) {
    %c0_i32 = arith.constant 0 : i32
    %c0_i32_0 = arith.constant 0 : i32
    %c0_i32_1 = arith.constant 0 : i32
    return %arg0, %c0_i32, %c0_i32_0 : i32, i32, i32
  }
  func.func @transform_13(%arg0: i32) -> (i32, i32, i32) {
    %c0_i32 = arith.constant 0 : i32
    %c0_i32_0 = arith.constant 0 : i32
    %c0_i32_1 = arith.constant 0 : i32
    return %arg0, %c0_i32, %c0_i32_0 : i32, i32, i32
  }
  func.func @transform_14(%arg0: i32) -> (i32, i32, i32) {
    %c0_i32 = arith.constant 0 : i32
    %c0_i32_0 = arith.constant 0 : i32
    %c0_i32_1 = arith.constant 0 : i32
    return %arg0, %c0_i32, %c0_i32_0 : i32, i32, i32
  }
  func.func @transform_15(%arg0: i32) -> (i32, i32, i32) {
    %c0_i32 = arith.constant 0 : i32
    %c0_i32_0 = arith.constant 0 : i32
    %c0_i32_1 = arith.constant 0 : i32
    return %arg0, %c0_i32, %c0_i32_0 : i32, i32, i32
  }
  func.func @transform_16(%arg0: i32) -> (i32, i32, i32) {
    %c0_i32 = arith.constant 0 : i32
    %c0_i32_0 = arith.constant 0 : i32
    %c0_i32_1 = arith.constant 0 : i32
    return %arg0, %c0_i32, %c0_i32_0 : i32, i32, i32
  }
  func.func @transform_17(%arg0: i32) -> (i32, i32) {
    %c0_i32 = arith.constant 0 : i32
    %c0_i32_0 = arith.constant 0 : i32
    %c0_i32_1 = arith.constant 0 : i32
    return %c0_i32, %c0_i32_0 : i32, i32
  }
  func.func @transform_18(%arg0: i32) -> (i32, i32) {
    %c0_i32 = arith.constant 0 : i32
    %c0_i32_0 = arith.constant 0 : i32
    %c0_i32_1 = arith.constant 0 : i32
    return %c0_i32, %c0_i32_0 : i32, i32
  }
  func.func @transform_19(%arg0: i32) -> (i32, i32) {
    %c0_i32 = arith.constant 0 : i32
    %c0_i32_0 = arith.constant 0 : i32
    %c0_i32_1 = arith.constant 0 : i32
    return %c0_i32, %c0_i32_0 : i32, i32
  }
  func.func @transform_20(%arg0: i32) -> (i32, i32) {
    %c0_i32 = arith.constant 0 : i32
    %c0_i32_0 = arith.constant 0 : i32
    %c0_i32_1 = arith.constant 0 : i32
    return %c0_i32, %c0_i32_0 : i32, i32
  }
  func.func @transform_21(%arg0: i32) -> (i32, i32) {
    %c0_i32 = arith.constant 0 : i32
    %c0_i32_0 = arith.constant 0 : i32
    %c0_i32_1 = arith.constant 0 : i32
    return %c0_i32, %c0_i32_0 : i32, i32
  }
}

</mosaic_0001>

<bundles_post_ra>
// kernel: vit_forward.1
= control target key start
LH: loop header
LB: loop body
LE: loop exit
PB: predicated region body
PF: predicated region fallthrough
CT: control target
= control target key end

     0   :  { %s3665_s0 = inlined_call_operand.vmem [shape: f32[8,256], index: 0, kind: input, shape index: {}]   ;;  %s3666_s1 = inlined_call_operand.vmem [shape: bf16[256,32], index: 1, kind: input, shape index: {}]   ;;  %s3667_s2 = inlined_call_operand.vmem [shape: f32[1,32], index: 2, kind: input, shape index: {}]   ;;  %s3668_s3 = inlined_call_operand.vmem [shape: f32[1,32], index: 3, kind: input, shape index: {}]   ;;  %s3669_s4 = inlined_call_operand.vmem [shape: f32[5,32], index: 4, kind: input, shape index: {}]   ;;  %s3670_s5 = inlined_call_operand.vmem [shape: f32[2,1,32], index: 5, kind: input, shape index: {}]   ;;  %s3671_s6 = inlined_call_operand.vmem [shape: f32[2,1,32], index: 6, kind: input, shape index: {}]   ;;  %s3672_s7 = inlined_call_operand.vmem [shape: bf16[2,32,96], index: 7, kind: input, shape index: {}]   ;;  %s3673_s8 = inlined_call_operand.vmem [shape: f32[2,1,96], index: 8, kind: input, shape index: {}]   ;;  %s3674_s9 = inlined_call_operand.vmem [shape: bf16[2,32,32], index: 9, kind: input, shape index: {}]   ;;  %s3675_s10 = inlined_call_operand.vmem [shape: f32[2,1,32], index: 10, kind: input, shape index: {}]   ;;  %s3676_s11 = inlined_call_operand.vmem [shape: f32[2,1,32], index: 11, kind: input, shape index: {}]   ;;  %s3677_s12 = inlined_call_operand.vmem [shape: f32[2,1,32], index: 12, kind: input, shape index: {}]   ;;  %s3678_s13 = inlined_call_operand.vmem [shape: bf16[2,32,64], index: 13, kind: input, shape index: {}]   ;;  %s3679_s14 = inlined_call_operand.vmem [shape: f32[2,1,64], index: 14, kind: input, shape index: {}]   ;;  %s3680_s15 = inlined_call_operand.vmem [shape: bf16[2,64,32], index: 15, kind: input, shape index: {}]   ;;  %s3681_s16 = inlined_call_operand.vmem [shape: f32[2,1,32], index: 16, kind: input, shape index: {}]   ;;  %s3682_s17 = inlined_call_operand.vmem [shape: f32[1,32], index: 17, kind: input, shape index: {}]   ;;  %s3683_s18 = inlined_call_operand.vmem [shape: f32[1,32], index: 18, kind: input, shape index: {}]   ;;  %s3684_s19 = inlined_call_operand.vmem [shape: bf16[32,10], index: 19, kind: input, shape index: {}]   ;;  %s3685_s20 = inlined_call_operand.vmem [shape: f32[1,10], index: 20, kind: input, shape index: {}]   ;;  %s3686_s21 = inlined_call_operand.hbm [shape: f32[2,10], index: 21, kind: output, shape index: {}]  }
   0x1   :  { %3691 = sst [smem:[#allocation8_spill]] %s3665_s0 }
   0x2   :  { %3692 = sst [smem:[#allocation9_spill]] %s3666_s1 }
   0x3   :  { %3693 = sst [smem:[#allocation10_spill]] %s3667_s2 }
   0x4   :  { %3694 = sst [smem:[#allocation11_spill]] %s3668_s3 }
   0x5   :  { %3695 = sst [smem:[#allocation12_spill]] %s3669_s4 }
   0x6   :  { %3696 = sst [smem:[#allocation13_spill]] %s3670_s5 }
   0x7   :  { %3697 = sst [smem:[#allocation14_spill]] %s3672_s7 }
   0x8   :  { %3698 = sst [smem:[#allocation15_spill]] %s3674_s9 }
   0x9   :  { %3699 = sst [smem:[#allocation16_spill]] %s3682_s17 }
   0xa   :  { %3700 = sst [smem:[#allocation17_spill]] %s3683_s18 }
   0xb   :  { %3701 = sst [smem:[#allocation18_spill]] %s3685_s20 }
   0xc   :  { %3702 = sst [smem:[#allocation19_spill]] %s3686_s21 }
   0xd   :  { %26 = vsyncpa [#allocation5], 0  ;;  %s3084_s2 = smov 0  }
   0xe LB: > { %3703 = sst [smem:[#allocation7_spill]] %s2955_s2  ;;  %s3090_s25 = sadd.s32 4294967295, %s2955_s2   ;;  %s2955_s2 = sphi %s3084_s2, %s32_s2  }
   0xf   : > { %p2642_p0 = scmp.ge.s32.totalorder %s2955_s2, 1  ;;  %p677_p1 = scmp.lt.s32.totalorder %s2955_s2, 3 }
  0x11   : > { %p678_p2 = pnand %p2642_p0, %p677_p1 }
  0x12   : > { %p771_p3 = scmp.lt.s32.totalorder (!%p678_p2), %s3090_s25, 1  ;;  %s3705_s7 = sld [smem:[#allocation14_spill]] (!%p678_p2) }
  0x13   : > { %681 = sbr.rel (%p678_p2) target bundleno = 2564 (0xa04), region = 104  ;;  %s3706_s9 = sld [smem:[#allocation15_spill]] (!%p678_p2) }
  0x14   : > { %p2651_p4 = scmp.ne.s32.totalorder (!%p678_p2), %s3090_s25, 0 }
  0x18   : > { %s3096_s26 = scalar_select %p771_p3, %s3090_s25, 1 }
  0x19   : > { %s3707_s24 = sld [smem:[#allocation9_spill]] (!%p2651_p4) }
  0x1a   : > { %s2792_s5 = sshll.u32 %s3096_s26, 4  ;;  %s795_s18 = scalar_lea.vmem %s3676_s11, %s3096_s26 }
  0x1b   : > { %s3114_s3 = scalar_lea.vmem %s3705_s7, %s2792_s5  ;;  %s3119_s20 = scalar_lea.vmem %s3706_s9, %s2792_s5 }
  0x1c   : > { %s798_s1 = scalar_lea.vmem %s3677_s12, %s3096_s26  ;;  %s3136_s7 = scalar_lea.vmem %s3678_s13, %s2792_s5 }
  0x1d   : > { %s2795_s17 = sshll.u32 %s3096_s26, 5  ;;  %819 = sbr.rel (%p2651_p4) target bundleno = 201 (0xc9), region = 108 }
  0x1e   : > { %s3146_s0 = scalar_lea.vmem %s3680_s15, %s2795_s17  ;;  %s3708_s22 = sld [smem:[#allocation8_spill]] (!%p2651_p4) }
  0x1f   : > { %s3709_s30 = sld [smem:[#allocation11_spill]] (!%p2651_p4) }
  0x20   : > { %s3710_s5 = sld [smem:[#allocation12_spill]] (!%p2651_p4) }
  0x21   : > { %s3711_s2 = sld [smem:[#allocation10_spill]] (!%p2651_p4) }
  0x22   : > { %v2803_v0 = vld [vmem:[%s3707_s24 + $0x38] sm:$0xff]  ;;  %v2802_v2 = vld [vmem:[%s3707_s24 + $0x30] sm:$0xff]  ;;  %v2801_v4 = vld [vmem:[%s3707_s24 + $0x28] sm:$0xff]  ;;  %vm985_vm0 = vcmask 253952   ;;  %vm994_vm1 = vcmask 257024  }
  0x23   : > { %v2811_v1 = vld [vmem:[%s3707_s24 + $0x78] sm:$0xff]  ;;  %956 = vmatpush.bf16.msra.mxu0 %v2803_v0  ;;  %v2810_v3 = vld [vmem:[%s3707_s24 + $0x70] sm:$0xff]  ;;  %v2809_v5 = vld [vmem:[%s3707_s24 + $0x68] sm:$0xff] }
  0x24   : > { %969 = vmatpush.bf16.msra.mxu1 %v2811_v1  ;;  %v2800_v6 = vld [vmem:[%s3707_s24 + $0x20] sm:$0xff]  ;;  %v2799_v8 = vld [vmem:[%s3707_s24 + $0x18] sm:$0xff]  ;;  %v2798_v10 = vld [vmem:[%s3707_s24 + $0x10] sm:$0xff] }
  0x25   : > { %v2808_v7 = vld [vmem:[%s3707_s24 + $0x60] sm:$0xff]  ;;  %v2807_v9 = vld [vmem:[%s3707_s24 + $0x58] sm:$0xff]  ;;  %v2806_v11 = vld [vmem:[%s3707_s24 + $0x50] sm:$0xff] }
  0x26   : > { %v2797_v12 = vld [vmem:[%s3707_s24 + $0x8] sm:$0xff]  ;;  %v2796_v14 = vld [vmem:[%s3707_s24] sm:$0xff] }
  0x27   : > { %957 = vmatpush.bf16.msra.mxu0 %v2802_v2  ;;  %v2805_v13 = vld [vmem:[%s3707_s24 + $0x48] sm:$0xff]  ;;  %v2804_v15 = vld [vmem:[%s3707_s24 + $0x40] sm:$0xff] }
  0x28   : > { %970 = vmatpush.bf16.msra.mxu1 %v2810_v3  ;;  %v820_v16 = vld [vmem:[%s3708_s22] sm:$0xff]  ;;  %v821_v17 = vld [vmem:[%s3708_s22 + $0x8] sm:$0xff] }
  0x29   : > { %v822_v18 = vpack.c.bf16 %v820_v16, %v820_v16  ;;  %v823_v19 = vpack.c.bf16 %v821_v17, %v821_v17  ;;  %v982_v20 = vld [vmem:[%s3709_s30] sm:$0x1]  ;;  %v991_v27 = vld [vmem:[%s3710_s5 + $0x1] sm:$0xf] }
  0x2a   : > { %v983_v21 = vld [vmem:[%s3710_s5] sm:$0x1] }
  0x2b   : > { %958 = vmatpush.bf16.msra.mxu0 %v2801_v4  ;;  %v984_v22 = vadd.f32 %v983_v21, %v982_v20  ;;  %v2855_v23 = vld [vmem:[%s3711_s2] ss:$0 sm:$0xff] }
  0x2c   : > { %971 = vmatpush.bf16.msra.mxu1 %v2809_v5 }
  0x2d   : > { %986 = vst.msk [vmem:[#allocation2] sm:$0x1] %vm985_vm0, %v984_v22 }
  0x2e   : > { %987 = vst.msk [vmem:[#allocation2 + $0x8] sm:$0x1] %vm985_vm0, %v984_v22 }
  0x2f   : > { %959 = vmatpush.bf16.msra.mxu0 %v2800_v6 }
  0x30   : > { %972 = vmatpush.bf16.msra.mxu1 %v2808_v7 }
  0x33   : > { %960 = vmatpush.bf16.msra.mxu0 %v2799_v8 }
  0x34   : > { %973 = vmatpush.bf16.msra.mxu1 %v2807_v9 }
  0x37   : > { %961 = vmatpush.bf16.msra.mxu0 %v2798_v10 }
  0x38   : > { %974 = vmatpush.bf16.msra.mxu1 %v2806_v11 }
  0x3b   : > { %962 = vmatpush.bf16.msra.mxu0 %v2797_v12 }
  0x3c   : > { %975 = vmatpush.bf16.msra.mxu1 %v2805_v13 }
  0x3f   : > { %963 = vmatpush.bf16.msra.mxu0 %v2796_v14 }
  0x40   : > { %976 = vmatpush.bf16.msra.mxu1 %v2804_v15 }
  0x42   : > { %964 = vmatmul.bf16.vlgmr.msra.gmra.mxu0 %v822_v18 }
  0x43   : > { %977 = vmatmul.bf16.vlgmr.msra.gmra.mxu1 %v823_v19 }
  0xbf   : > { %v965_v24 = vpop.f32.mrf.mxu0 }
  0xc0   : > { %v978_v25 = vpop.f32.mrf.mxu1  ;;  %v966_v26 = vadd.f32 %v2855_v23, %v965_v24 }
  0xc2   : > { %v979_v28 = vadd.f32 %v978_v25, %v966_v26 }
  0xc4   : > { %v989_v29 = vrot.slane %v979_v28, 4  ;;  %v992_v30 = vadd.f32 %v991_v27, %v979_v28 }
  0xc6   : > { %v993_v31 = vadd.f32 %v991_v27, %v989_v29  ;;  %995 = vst.msk [vmem:[#allocation2 + $0x1] sm:$0xf] %vm994_vm1, %v992_v30 }
  0xc7   : > { %v967_v32 = vpop.f32.mrf.mxu0 }
  0xc8   : > { %v980_v33 = vpop.f32.mrf.mxu1  ;;  %996 = vst.msk [vmem:[#allocation2 + $0x9] sm:$0xf] %vm994_vm1, %v993_v31 }
  0xc9 PF: > { %vm1001_vm2 = vcmask 258048   ;;  %v2957_v42 = vmov 32.0   ;;  %v2813_v5 = vld [vmem:[%s3114_s3 + $0x8] sm:$0xff]  ;;  %s3712_s28 = sld [smem:[#allocation13_spill]]  ;;  %s3714_s27 = scalar_lea.vmem %s3671_s6, %s3096_s26  ;;  %v2812_v14 = vld [vmem:[%s3114_s3] sm:$0xff]  ;;  %vm1119_vm10 = vcmask 261120  }
  0xca   : > { %2864 = vrcp.f32 %v2957_v42  ;;  %1129 = vmatpush.bf16.msra.mxu0 %v2813_v5  ;;  %v2857_v12 = vld [vmem:[%s3714_s27] ss:$0 sm:$0xff]  ;;  %s3715_s2 = scalar_lea.vmem %s3673_s8, %s3096_s26  ;;  %s2958_s17 = smov 96   ;;  %vm1240_vm11 = vcmask 64512   ;;  %vm1284_vm12 = vcmask 36864   ;;  %vm1318_vm13 = vcmask 1041408  }
  0xcb   : > { %s2959_s9 = smov 120   ;;  %s2960_s29 = smov 88   ;;  %vm1319_vm14 = vcmask 1042432   ;;  %vm1314_vm15 = vcmask 39936   ;;  %vm1362_vm0 = vcmask 61440   ;;  %vm1563_vm1 = vcmask 127040  }
  0xcc   : > { %s2963_s4 = smov 104   ;;  %s2964_s23 = smov 72  }
  0xcd   : > { %v997_v34 = vld [vmem:[#allocation2] sm:$0x1f]  ;;  %s2965_s27 = smov 64   ;;  %s2966_s3 = smov 56  }
  0xce   : > { %v1002_v36 = vsel %vm1001_vm2, %v997_v34, 0.0  ;;  %v1017_v37 = vmul.f32 %v997_v34, %v997_v34  ;;  %1130 = vmatpush.bf16.msra.mxu0 %v2812_v14  ;;  %s2968_s21 = smov 48   ;;  %p2778_p5 = scmp.ne.s32.totalorder %s3090_s25, 1 }
  0xcf   : > { %v3219_v35 = vld [vmem:[#allocation2 + $0x8] sm:$0x1f]  ;;  %1003 = vadd.xlane.f32.xlu0 %v1002_v36  ;;  %s3713_s30 = scalar_lea.vmem %s3712_s28, %s3096_s26  ;;  %v2858_v36 = vld [vmem:[%s3715_s2] ss:$0 sm:$0xff]  ;;  %s2961_s28 = smov 112  }
  0xd0   : > { %v1019_v38 = vsel %vm1001_vm2, %v1017_v37, 0.0  ;;  %v1018_v39 = vmul.f32 %v3219_v35, %v3219_v35  ;;  %v1005_v40 = vsel %vm1001_vm2, %v3219_v35, 0.0  ;;  %v2865_v43 = vpop.eup %2864  ;;  %v2856_v9 = vld [vmem:[%s3713_s30] ss:$0 sm:$0xff]  ;;  %s2962_s30 = smov 80   ;;  %s2969_s2 = smov 40  }
  0xd1   : > { %1020 = vadd.xlane.f32.xlu1 %v1019_v38  ;;  %v1009_v44 = vmul.f32 32.0, %v2865_v43  ;;  %vm1013_vm3 = vweird.f32 %v2865_v43 }
  0xd2   : > { %v1022_v41 = vsel %vm1001_vm2, %v1018_v39, 0.0 }
  0xd3   : > { %v1010_v45 = vsub.f32 1.0, %v1009_v44 }
  0xd5   : > { %v1011_v46 = vmul.f32 %v2865_v43, %v1010_v45 }
  0xd7   : > { %1006 = vadd.xlane.f32.xlu0 %v1005_v40  ;;  %v1012_v47 = vadd.f32 %v2865_v43, %v1011_v46 }
  0xd9   : > { %1023 = vadd.xlane.f32.xlu1 %v1022_v41  ;;  %v3228_v48 = vsel %vm1013_vm3, %v2865_v43, %v1012_v47  ;;  %vm1764_vm3 = vcmask 192640  }
 0x142   : > { %v1004_v49 = vpop.xlane.xlu0 %1003 }
 0x143   : > { %v1015_v50 = vmul.f32 %v3228_v48, %v1004_v49 }
 0x144   : > { %v1021_v51 = vpop.xlane.xlu1 %1020 }
 0x145   : > { %v1027_v52 = vmul.f32 %v1015_v50, %v1015_v50  ;;  %v1025_v53 = vmul.f32 %v1021_v51, %v3228_v48  ;;  %v1031_v8 = vsub.f32 %v997_v34, %v1015_v50 }
 0x147   : > { %v1029_v54 = vsub.f32 %v1025_v53, %v1027_v52 }
 0x149   : > { %v1033_v55 = vadd.f32 1e-05, %v1029_v54 }
 0x14a   : > { %v1007_v56 = vpop.xlane.xlu0 %1006 }
 0x14b   : > { %2866 = vrsqrt.f32 %v1033_v55  ;;  %v1016_v57 = vmul.f32 %v3228_v48, %v1007_v56  ;;  %vm1041_vm5 = vweird.f32 %v1033_v55 }
 0x14c   : > { %v1024_v58 = vpop.xlane.xlu1 %1023 }
 0x14d   : > { %v1028_v59 = vmul.f32 %v1016_v57, %v1016_v57  ;;  %v1026_v60 = vmul.f32 %v1024_v58, %v3228_v48  ;;  %v1032_v23 = vsub.f32 %v3219_v35, %v1016_v57 }
 0x14f   : > { %v1030_v61 = vsub.f32 %v1026_v60, %v1028_v59 }
 0x151   : > { %v2867_v62 = vpop.eup %2866  ;;  %v1034_v63 = vadd.f32 1e-05, %v1030_v61 }
 0x152   : > { %v1036_v0 = vmul.f32 %v2867_v62, %v1033_v55  ;;  %vm1042_vm4 = vweird.f32 %v2867_v62 }
 0x153   : > { %2868 = vrsqrt.f32 %v1034_v63  ;;  %vm1043_vm6 = vmor %vm1041_vm5, %vm1042_vm4  ;;  %vm1051_vm8 = vweird.f32 %v1034_v63  ;;  %vm1965_vm4 = vcmask 258240  }
 0x154   : > { %v1037_v1 = vmul.f32 %v2867_v62, %v1036_v0 }
 0x156   : > { %v1038_v2 = vmul.f32 0.5, %v1037_v1 }
 0x158   : > { %v1039_v3 = vsub.f32 1.5, %v1038_v2 }
 0x159   : > { %v2869_v4 = vpop.eup %2868 }
 0x15a   : > { %v1040_v6 = vmul.f32 %v2867_v62, %v1039_v3  ;;  %v1046_v7 = vmul.f32 %v2869_v4, %v1034_v63  ;;  %vm1052_vm7 = vweird.f32 %v2869_v4 }
 0x15b   : > { %vm1053_vm9 = vmor %vm1051_vm8, %vm1052_vm7 }
 0x15c   : > { %v1044_v10 = vsel %vm1043_vm6, %v2867_v62, %v1040_v6  ;;  %v1047_v11 = vmul.f32 %v2869_v4, %v1046_v7 }
 0x15d   : > { %v1055_v13 = vmul.f32 %v1044_v10, %v1031_v8 }
 0x15e   : > { %v1048_v15 = vmul.f32 0.5, %v1047_v11 }
 0x15f   : > { %v1060_v16 = vmul.f32 %v2856_v9, %v1055_v13 }
 0x160   : > { %v1049_v17 = vsub.f32 1.5, %v1048_v15 }
 0x161   : > { %v1065_v18 = vadd.f32 %v2857_v12, %v1060_v16 }
 0x162   : > { %v1050_v19 = vmul.f32 %v2869_v4, %v1049_v17 }
 0x163   : > { %v1069_v20 = vrot.slane %v1065_v18, 1  ;;  %v1070_v21 = vrot.slane %v1065_v18, 2  ;;  %v1071_v22 = vrot.slane %v1065_v18, 3  ;;  %1077 = vst [vmem:[#allocation1] ss:$9 sm:$0xff] %v1065_v18  ;;  %v1072_v24 = vrot.slane %v1065_v18, 4 }
 0x164   : > { %v1054_v25 = vsel %vm1053_vm9, %v2869_v4, %v1050_v19 }
 0x165   : > { %1079 = vst [vmem:[#allocation1 + $0x1] ss:$9 sm:$0xff] %v1069_v20  ;;  %v1056_v26 = vmul.f32 %v1054_v25, %v1032_v23 }
 0x166   : > { %1081 = vst [vmem:[#allocation1 + $0x2] ss:$9 sm:$0xff] %v1070_v21 }
 0x167   : > { %1083 = vst [vmem:[#allocation1 + $0x3] ss:$9 sm:$0xff] %v1071_v22  ;;  %v1061_v27 = vmul.f32 %v2856_v9, %v1056_v26 }
 0x168   : > { %1085 = vst [vmem:[#allocation1 + $0x4] ss:$9 sm:$0xff] %v1072_v24 }
 0x169   : > { %v1066_v28 = vadd.f32 %v2857_v12, %v1061_v27 }
 0x16b   : > { %v1073_v29 = vrot.slane %v1066_v28, 1  ;;  %v1074_v30 = vrot.slane %v1066_v28, 2  ;;  %1087 = vst [vmem:[#allocation1 + $0x5] ss:$9 sm:$0xff] %v1066_v28  ;;  %v1075_v31 = vrot.slane %v1066_v28, 3  ;;  %v1076_v32 = vrot.slane %v1066_v28, 4 }
 0x16d   : > { %1089 = vst [vmem:[#allocation1 + $0x6] ss:$9 sm:$0xff] %v1073_v29 }
 0x16e   : > { %1091 = vst [vmem:[#allocation1 + $0x7] ss:$9 sm:$0xff] %v1074_v30 }
 0x175   : > { %v1092_v33 = vld [vmem:[#allocation1] sm:$0xff] }
 0x176   : > { %1093 = vst [vmem:[#allocation1] ss:$9 sm:$0xff] %v1075_v31 }
 0x177   : > { %1094 = vst [vmem:[#allocation1 + $0x1] ss:$9 sm:$0xff] %v1076_v32 }
 0x17e   : > { %v1095_v34 = vld [vmem:[#allocation1] sm:$0xff] }
 0x17f   : > { %v1098_v35 = vpack.c.bf16 %v1095_v34, %v1092_v33 }
 0x181   : > { %2724 = vmatmul.msk.bf16.vlgmr.msra.gmra.mxu0 %vm1119_vm10, %v1098_v35 }
 0x1fe   : > { %v1132_v37 = vpop.f32.mrf.mxu0 }
 0x1ff   : > { %v3253_v38 = vadd.f32 %v2858_v36, %v1132_v37 }
 0x201   : > { %v3256_v39 = vrot.slane %v3253_v38, 1  ;;  %v3259_v40 = vrot.slane %v3253_v38, 2  ;;  %v3262_v41 = vrot.slane %v3253_v38, 3  ;;  %v3265_v42 = vrot.slane %v3253_v38, 4 }
 0x202   : > { %v3268_v43 = vmul.f32 0.35355338, %v3253_v38  ;;  %v3290_v51 = vrot.slane %v3253_v38, 5  ;;  %v3293_v52 = vrot.slane %v3253_v38, 6  ;;  %v3296_v53 = vrot.slane %v3253_v38, 7 }
 0x203   : > { %v3271_v44 = vmul.f32 0.35355338, %v3256_v39  ;;  %v3274_v45 = vmul.f32 0.35355338, %v3259_v40  ;;  %v3277_v46 = vmul.f32 0.35355338, %v3262_v41 }
 0x204   : > { %v3280_v47 = vmul.f32 0.35355338, %v3265_v42  ;;  %1175 = vst [vmem:[#allocation1] ss:$9 sm:$0xff] %v3268_v43  ;;  %v3302_v55 = vmul.f32 0.35355338, %v3290_v51 }
 0x205   : > { %1177 = vst [vmem:[#allocation1 + $0x1] ss:$9 sm:$0xff] %v3271_v44  ;;  %v3305_v56 = vmul.f32 0.35355338, %v3293_v52  ;;  %v3310_v58 = vmul.f32 0.35355338, %v3296_v53 }
 0x206   : > { %v1134_v49 = vpop.f32.mrf.mxu0  ;;  %1179 = vst [vmem:[#allocation1 + $0x2] ss:$9 sm:$0xff] %v3274_v45 }
 0x207   : > { %1181 = vst [vmem:[#allocation1 + $0x3] ss:$9 sm:$0xff] %v3277_v46  ;;  %v3287_v50 = vadd.f32 %v2858_v36, %v1134_v49 }
 0x208   : > { %1183 = vst [vmem:[#allocation1 + $0x4] ss:$9 sm:$0xff] %v3280_v47 }
 0x209   : > { %v3299_v54 = vrot.slane %v3287_v50, 1  ;;  %v3318_v60 = vmul.f32 0.35355338, %v3287_v50 }
 0x20b   : > { %v3314_v59 = vmul.f32 0.35355338, %v3299_v54 }
 0x20f   : > { %v3307_v57 = vld [vmem:[#allocation1] sm:$0xff] }
 0x210   : > { %1185 = vst [vmem:[#allocation1] ss:$9 sm:$0xff] %v3302_v55 }
 0x211   : > { %1186 = vst [vmem:[#allocation1 + $0x1] ss:$9 sm:$0xff] %v3305_v56 }
 0x212   : > { %1187 = vst [vmem:[#allocation1 + $0x2] ss:$9 sm:$0xff] %v3310_v58 }
 0x213   : > { %1188 = vst [vmem:[#allocation1 + $0x3] ss:$9 sm:$0xff] %v3318_v60 }
 0x214   : > { %1189 = vst [vmem:[#allocation1 + $0x4] ss:$9 sm:$0xff] %v3314_v59 }
 0x21b   : > { %v3323_v61 = vld [vmem:[#allocation1] sm:$0xff] }
 0x21c   : > { %1195 = vst [vmem:[#allocation1] ss:$9 sm:$0xff] %v3253_v38 }
 0x21d   : > { %1197 = vst [vmem:[#allocation1 + $0x1] ss:$9 sm:$0xff] %v3256_v39 }
 0x21e   : > { %1199 = vst [vmem:[#allocation1 + $0x2] ss:$9 sm:$0xff] %v3259_v40 }
 0x21f   : > { %1201 = vst [vmem:[#allocation1 + $0x3] ss:$9 sm:$0xff] %v3262_v41 }
 0x220   : > { %1203 = vst [vmem:[#allocation1 + $0x4] ss:$9 sm:$0xff] %v3265_v42 }
 0x227   : > { %v1204_v62 = vld [vmem:[#allocation1] sm:$0xff] }
 0x228   : > { %1205 = vst [vmem:[#allocation1] ss:$9 sm:$0xff] %v3290_v51  ;;  %v1213_v3 = vpack.c.bf16 %v1204_v62, %v1204_v62  ;;  %v1193_v62 = vpack.c.bf16 %v3307_v57, %v3307_v57 }
 0x229   : > { %1206 = vst [vmem:[#allocation1 + $0x1] ss:$9 sm:$0xff] %v3293_v52 }
 0x22a   : > { %1207 = vst [vmem:[#allocation1 + $0x2] ss:$9 sm:$0xff] %v3296_v53  ;;  %v1236_v4 = vunpack.c.l.b16 %v1213_v3 }
 0x22b   : > { %1208 = vst [vmem:[#allocation1 + $0x3] ss:$9 sm:$0xff] %v3287_v50 }
 0x22c   : > { %1209 = vst [vmem:[#allocation1 + $0x4] ss:$9 sm:$0xff] %v3299_v54  ;;  %v1237_v5 = vpack.c.b16 %v1236_v4, %v1236_v4 }
 0x22e   : > { %1238 = vrot.lane.b32.xlu2 %v1237_v5, %s2958_s17 }
 0x233   : > { %v1210_v63 = vld [vmem:[#allocation1] sm:$0xff] }
 0x234   : > { %1215 = vst [vmem:[#allocation1] ss:$9 sm:$0xff] %v3253_v38  ;;  %v1214_v7 = vpack.c.bf16 %v1210_v63, %v1210_v63 }
 0x235   : > { %1217 = vst [vmem:[#allocation1 + $0x1] ss:$9 sm:$0xff] %v3256_v39 }
 0x236   : > { %1219 = vst [vmem:[#allocation1 + $0x2] ss:$9 sm:$0xff] %v3259_v40  ;;  %v1261_v8 = vunpack.c.l.b16 %v1214_v7  ;;  %v1194_v7 = vpack.c.bf16 %v3323_v61, %v3323_v61 }
 0x237   : > { %1221 = vst [vmem:[#allocation1 + $0x3] ss:$9 sm:$0xff] %v3262_v41 }
 0x238   : > { %1223 = vst [vmem:[#allocation1 + $0x4] ss:$9 sm:$0xff] %v3265_v42  ;;  %v1262_v9 = vpack.c.b16 %v1261_v8, %v1261_v8 }
 0x23a   : > { %1263 = vrot.lane.b32.xlu2 %v1262_v9, %s2958_s17  ;;  %s2970_s17 = smov 8  }
 0x23f   : > { %v3340_v0 = vld [vmem:[#allocation1] sm:$0xff] }
 0x240   : > { %1225 = vst [vmem:[#allocation1] ss:$9 sm:$0xff] %v3290_v51 }
 0x241   : > { %1226 = vst [vmem:[#allocation1 + $0x1] ss:$9 sm:$0xff] %v3293_v52 }
 0x242   : > { %1227 = vst [vmem:[#allocation1 + $0x2] ss:$9 sm:$0xff] %v3296_v53 }
 0x243   : > { %1228 = vst [vmem:[#allocation1 + $0x3] ss:$9 sm:$0xff] %v3287_v50 }
 0x244   : > { %1229 = vst [vmem:[#allocation1 + $0x4] ss:$9 sm:$0xff] %v3299_v54 }
 0x24b   : > { %v3347_v1 = vld [vmem:[#allocation1] sm:$0xff] }
 0x24c   : > { %1365 = vst [vmem:[#allocation1] ss:$9 sm:$0xff] %v3268_v43 }
 0x24d   : > { %1367 = vst [vmem:[#allocation1 + $0x1] ss:$9 sm:$0xff] %v3271_v44 }
 0x24e   : > { %1369 = vst [vmem:[#allocation1 + $0x2] ss:$9 sm:$0xff] %v3274_v45 }
 0x24f   : > { %1371 = vst [vmem:[#allocation1 + $0x3] ss:$9 sm:$0xff] %v3277_v46 }
 0x250   : > { %1373 = vst [vmem:[#allocation1 + $0x4] ss:$9 sm:$0xff] %v3280_v47 }
 0x257   : > { %v1374_v2 = vld [vmem:[#allocation1] sm:$0xff] }
 0x258   : > { %1375 = vst [vmem:[#allocation1] ss:$9 sm:$0xff] %v3302_v55  ;;  %v1383_v12 = vpack.c.bf16 %v1374_v2, %v1374_v2 }
 0x259   : > { %1376 = vst [vmem:[#allocation1 + $0x1] ss:$9 sm:$0xff] %v3305_v56 }
 0x25a   : > { %1377 = vst [vmem:[#allocation1 + $0x2] ss:$9 sm:$0xff] %v3310_v58  ;;  %v1426_v13 = vunpack.c.l.b16 %v1383_v12 }
 0x25b   : > { %1378 = vst [vmem:[#allocation1 + $0x3] ss:$9 sm:$0xff] %v3318_v60 }
 0x25c   : > { %1379 = vst [vmem:[#allocation1 + $0x4] ss:$9 sm:$0xff] %v3314_v59  ;;  %v1427_v14 = vpack.c.b16 %v1426_v13, %v1426_v13 }
 0x25e   : > { %1428 = vrot.lane.b32.xlu2 %v1427_v14, %s2959_s9 }
 0x263   : > { %v1380_v6 = vld [vmem:[#allocation1] sm:$0xff] }
 0x264   : > { %1385 = vst [vmem:[#allocation1] ss:$9 sm:$0xff] %v3253_v38  ;;  %v1384_v15 = vpack.c.bf16 %v1380_v6, %v1380_v6 }
 0x265   : > { %1387 = vst [vmem:[#allocation1 + $0x1] ss:$9 sm:$0xff] %v3256_v39 }
 0x266   : > { %1389 = vst [vmem:[#allocation1 + $0x2] ss:$9 sm:$0xff] %v3259_v40  ;;  %v1455_v16 = vunpack.c.l.b16 %v1384_v15 }
 0x267   : > { %1391 = vst [vmem:[#allocation1 + $0x3] ss:$9 sm:$0xff] %v3262_v41 }
 0x268   : > { %1393 = vst [vmem:[#allocation1 + $0x4] ss:$9 sm:$0xff] %v3265_v42  ;;  %v1456_v18 = vpack.c.b16 %v1455_v16, %v1455_v16 }
 0x26a   : > { %1457 = vrot.lane.b32.xlu2 %v1456_v18, %s2959_s9  ;;  %s2971_s9 = smov 16  }
 0x26f   : > { %v1394_v10 = vld [vmem:[#allocation1] sm:$0xff] }
 0x270   : > { %1395 = vst [vmem:[#allocation1] ss:$9 sm:$0xff] %v3290_v51  ;;  %v1403_v19 = vpack.c.bf16 %v1394_v10, %v1394_v10 }
 0x271   : > { %1396 = vst [vmem:[#allocation1 + $0x1] ss:$9 sm:$0xff] %v3293_v52 }
 0x272   : > { %1397 = vst [vmem:[#allocation1 + $0x2] ss:$9 sm:$0xff] %v3296_v53  ;;  %v1431_v20 = vunpack.c.l.b16 %v1403_v19 }
 0x273   : > { %1398 = vst [vmem:[#allocation1 + $0x3] ss:$9 sm:$0xff] %v3287_v50 }
 0x274   : > { %1399 = vst [vmem:[#allocation1 + $0x4] ss:$9 sm:$0xff] %v3299_v54  ;;  %v1432_v21 = vpack.c.b16 %v1431_v20, %v1431_v20 }
 0x276   : > { %1433 = vrot.lane.b32.xlu0 %v1432_v21, %s2960_s29 }
 0x27b   : > { %v1400_v11 = vld [vmem:[#allocation1] sm:$0xff] }
 0x27c   : > { %1405 = vst [vmem:[#allocation1] ss:$9 sm:$0xff] %v3253_v38  ;;  %v1404_v23 = vpack.c.bf16 %v1400_v11, %v1400_v11 }
 0x27d   : > { %1407 = vst [vmem:[#allocation1 + $0x1] ss:$9 sm:$0xff] %v3256_v39 }
 0x27e   : > { %1409 = vst [vmem:[#allocation1 + $0x2] ss:$9 sm:$0xff] %v3259_v40  ;;  %v1460_v24 = vunpack.c.l.b16 %v1404_v23 }
 0x27f   : > { %1411 = vst [vmem:[#allocation1 + $0x3] ss:$9 sm:$0xff] %v3262_v41 }
 0x280   : > { %1413 = vst [vmem:[#allocation1 + $0x4] ss:$9 sm:$0xff] %v3265_v42  ;;  %v1461_v25 = vpack.c.b16 %v1460_v24, %v1460_v24 }
 0x282   : > { %1462 = vrot.lane.b32.xlu1 %v1461_v25, %s2960_s29  ;;  %v1234_v25 = vpack.c.bf16 %v3347_v1, %v3347_v1  ;;  %s2972_s29 = smov 24  }
 0x287   : > { %v3374_v17 = vld [vmem:[#allocation1] sm:$0xff] }
 0x288   : > { %1415 = vst [vmem:[#allocation1] ss:$9 sm:$0xff] %v3290_v51  ;;  %v1239_v32 = vpop.permute.xlu2 %1238 }
 0x289   : > { %1416 = vst [vmem:[#allocation1 + $0x1] ss:$9 sm:$0xff] %v3293_v52  ;;  %v1245_v34 = vsel %vm1240_vm11, %v1239_v32, 0 }
 0x28a   : > { %1417 = vst [vmem:[#allocation1 + $0x2] ss:$9 sm:$0xff] %v3296_v53  ;;  %1254 = vmatpush.bf16.xpose.msra.mxu1 %v1245_v34 }
 0x28b   : > { %1418 = vst [vmem:[#allocation1 + $0x3] ss:$9 sm:$0xff] %v3287_v50 }
 0x28c   : > { %1419 = vst [vmem:[#allocation1 + $0x4] ss:$9 sm:$0xff] %v3299_v54 }
 0x291   : > { %2725 = vmatmul.msk.bf16.vlgmr.msra.gmra.mxu1 %vm1240_vm11, %v1193_v62 }
 0x293   : > { %v3381_v22 = vld [vmem:[#allocation1] sm:$0xff] }
 0x294   : > { %1566 = vst [vmem:[#allocation1] ss:$9 sm:$0xff] %v3268_v43  ;;  %v1264_v63 = vpop.permute.xlu2 %1263 }
 0x295   : > { %1568 = vst [vmem:[#allocation1 + $0x1] ss:$9 sm:$0xff] %v3271_v44  ;;  %v1269_v4 = vsel %vm1240_vm11, %v1264_v63, 0 }
 0x296   : > { %1570 = vst [vmem:[#allocation1 + $0x2] ss:$9 sm:$0xff] %v3274_v45  ;;  %1278 = vmatpush.bf16.xpose.msra.mxu2 %v1269_v4  ;;  %v1423_v4 = vpack.c.bf16 %v3374_v17, %v3374_v17 }
 0x297   : > { %1572 = vst [vmem:[#allocation1 + $0x3] ss:$9 sm:$0xff] %v3277_v46 }
 0x298   : > { %1574 = vst [vmem:[#allocation1 + $0x4] ss:$9 sm:$0xff] %v3280_v47 }
 0x29d   : > { %2726 = vmatmul.msk.bf16.vlgmr.msra.gmra.mxu2 %vm1240_vm11, %v1194_v7 }
 0x29f   : > { %v1575_v26 = vld [vmem:[#allocation1] sm:$0xff] }
 0x2a0   : > { %1576 = vst [vmem:[#allocation1] ss:$9 sm:$0xff] %v3302_v55  ;;  %v1584_v37 = vpack.c.bf16 %v1575_v26, %v1575_v26  ;;  %v1339_v26 = vunpack.c.l.b16 %v1234_v25 }
 0x2a1   : > { %1577 = vst [vmem:[#allocation1 + $0x1] ss:$9 sm:$0xff] %v3305_v56 }
 0x2a2   : > { %1578 = vst [vmem:[#allocation1 + $0x2] ss:$9 sm:$0xff] %v3310_v58  ;;  %v1627_v3 = vunpack.c.l.b16 %v1584_v37 }
 0x2a3   : > { %1579 = vst [vmem:[#allocation1 + $0x3] ss:$9 sm:$0xff] %v3318_v60 }
 0x2a4   : > { %1580 = vst [vmem:[#allocation1 + $0x4] ss:$9 sm:$0xff] %v3314_v59  ;;  %v1628_v6 = vpack.c.b16 %v1627_v3, %v1627_v3 }
 0x2ab   : > { %v1581_v27 = vld [vmem:[#allocation1] sm:$0xff] }
 0x2ac   : > { %1586 = vst [vmem:[#allocation1] ss:$9 sm:$0xff] %v3253_v38  ;;  %v1585_v28 = vpack.c.bf16 %v1581_v27, %v1581_v27 }
 0x2ad   : > { %1588 = vst [vmem:[#allocation1 + $0x1] ss:$9 sm:$0xff] %v3256_v39 }
 0x2ae   : > { %1590 = vst [vmem:[#allocation1 + $0x2] ss:$9 sm:$0xff] %v3259_v40  ;;  %v1656_v29 = vunpack.c.l.b16 %v1585_v28  ;;  %v1340_v28 = vpack.c.b16 %v1339_v26, %v1339_v26 }
 0x2af   : > { %1592 = vst [vmem:[#allocation1 + $0x3] ss:$9 sm:$0xff] %v3262_v41 }
 0x2b0   : > { %1594 = vst [vmem:[#allocation1 + $0x4] ss:$9 sm:$0xff] %v3265_v42  ;;  %v1657_v31 = vpack.c.b16 %v1656_v29, %v1656_v29  ;;  %v1424_v29 = vpack.c.bf16 %v3381_v22, %v3381_v22 }
 0x2b2   : > { %1658 = vrot.lane.b32.xlu1 %v1657_v31, %s2961_s28  ;;  %v1233_v31 = vpack.c.bf16 %v3340_v0, %v3340_v0 }
 0x2b7   : > { %v1595_v30 = vld [vmem:[#allocation1] sm:$0xff] }
 0x2b8   : > { %1596 = vst [vmem:[#allocation1] ss:$9 sm:$0xff] %v3290_v51  ;;  %v1604_v33 = vpack.c.bf16 %v1595_v30, %v1595_v30  ;;  %v1429_v12 = vpop.permute.xlu2 %1428  ;;  %v1532_v30 = vunpack.c.l.b16 %v1424_v29 }
 0x2b9   : > { %1597 = vst [vmem:[#allocation1 + $0x1] ss:$9 sm:$0xff] %v3293_v52 }
 0x2ba   : > { %1598 = vst [vmem:[#allocation1 + $0x2] ss:$9 sm:$0xff] %v3296_v53  ;;  %v1632_v35 = vunpack.c.l.b16 %v1604_v33  ;;  %v1533_v32 = vpack.c.b16 %v1532_v30, %v1532_v30  ;;  %v1310_v33 = vunpack.c.l.b16 %v1233_v31 }
 0x2bb   : > { %1599 = vst [vmem:[#allocation1 + $0x3] ss:$9 sm:$0xff] %v3287_v50 }
 0x2bc   : > { %1600 = vst [vmem:[#allocation1 + $0x4] ss:$9 sm:$0xff] %v3299_v54  ;;  %v1633_v36 = vpack.c.b16 %v1632_v35, %v1632_v35  ;;  %v1311_v34 = vpack.c.b16 %v1310_v33, %v1310_v33 }
 0x2be   : > { %1634 = vrot.lane.b32.xlu2 %v1633_v36, %s2962_s30 }
 0x2c3   : > { %v1601_v49 = vld [vmem:[#allocation1] sm:$0xff] }
 0x2c4   : > { %1606 = vst [vmem:[#allocation1] ss:$9 sm:$0xff] %v3253_v38  ;;  %v1605_v2 = vpack.c.bf16 %v1601_v49, %v1601_v49  ;;  %v1458_v20 = vpop.permute.xlu2 %1457 }
 0x2c5   : > { %1608 = vst [vmem:[#allocation1 + $0x1] ss:$9 sm:$0xff] %v3256_v39 }
 0x2c6   : > { %1610 = vst [vmem:[#allocation1 + $0x2] ss:$9 sm:$0xff] %v3259_v40  ;;  %v1661_v5 = vunpack.c.l.b16 %v1605_v2  ;;  %1629 = vrot.lane.b32.xlu2 %v1628_v6, %s2961_s28 }
 0x2c7   : > { %1612 = vst [vmem:[#allocation1 + $0x3] ss:$9 sm:$0xff] %v3262_v41 }
 0x2c8   : > { %1614 = vst [vmem:[#allocation1 + $0x4] ss:$9 sm:$0xff] %v3265_v42  ;;  %v1662_v57 = vpack.c.b16 %v1661_v5, %v1661_v5 }
 0x2ca   : > { %1663 = vrot.lane.b32.xlu0 %v1662_v57, %s2962_s30  ;;  %v1508_v57 = vunpack.c.l.b16 %v1423_v4  ;;  %s3716_s30 = scalar_lea.vmem %s3675_s10, %s3096_s26 }
 0x2cc   : > { %v1509_v6 = vpack.c.b16 %v1508_v57, %v1508_v57 }
 0x2cf   : > { %v3418_v8 = vld [vmem:[#allocation1] sm:$0xff] }
 0x2d0   : > { %1616 = vst [vmem:[#allocation1] ss:$9 sm:$0xff] %v3290_v51 }
 0x2d1   : > { %1617 = vst [vmem:[#allocation1 + $0x1] ss:$9 sm:$0xff] %v3293_v52 }
 0x2d2   : > { %1618 = vst [vmem:[#allocation1 + $0x2] ss:$9 sm:$0xff] %v3296_v53 }
 0x2d3   : > { %1619 = vst [vmem:[#allocation1 + $0x3] ss:$9 sm:$0xff] %v3287_v50 }
 0x2d4   : > { %1620 = vst [vmem:[#allocation1 + $0x4] ss:$9 sm:$0xff] %v3299_v54 }
 0x2db   : > { %v3425_v9 = vld [vmem:[#allocation1] sm:$0xff] }
 0x2dc   : > { %1767 = vst [vmem:[#allocation1] ss:$9 sm:$0xff] %v3268_v43 }
 0x2dd   : > { %1769 = vst [vmem:[#allocation1 + $0x1] ss:$9 sm:$0xff] %v3271_v44 }
 0x2de   : > { %1771 = vst [vmem:[#allocation1 + $0x2] ss:$9 sm:$0xff] %v3274_v45 }
 0x2df   : > { %1773 = vst [vmem:[#allocation1 + $0x3] ss:$9 sm:$0xff] %v3277_v46 }
 0x2e0   : > { %1775 = vst [vmem:[#allocation1 + $0x4] ss:$9 sm:$0xff] %v3280_v47 }
 0x2e7   : > { %v1776_v61 = vld [vmem:[#allocation1] sm:$0xff] }
 0x2e8   : > { %1777 = vst [vmem:[#allocation1] ss:$9 sm:$0xff] %v3302_v55  ;;  %v1785_v10 = vpack.c.bf16 %v1776_v61, %v1776_v61 }
 0x2e9   : > { %1778 = vst [vmem:[#allocation1 + $0x1] ss:$9 sm:$0xff] %v3305_v56 }
 0x2ea   : > { %1779 = vst [vmem:[#allocation1 + $0x2] ss:$9 sm:$0xff] %v3310_v58  ;;  %v1828_v11 = vunpack.c.l.b16 %v1785_v10  ;;  %v1434_v58 = vpop.permute.xlu0 %1433 }
 0x2eb   : > { %1780 = vst [vmem:[#allocation1 + $0x3] ss:$9 sm:$0xff] %v3318_v60 }
 0x2ec   : > { %1781 = vst [vmem:[#allocation1 + $0x4] ss:$9 sm:$0xff] %v3314_v59  ;;  %v1829_v43 = vpack.c.b16 %v1828_v11, %v1828_v11  ;;  %v1439_v59 = vsel %vm1240_vm11, %v1434_v58, 0 }
 0x2ed   : > { %1448 = vmatpush.bf16.xpose.msrb.mxu0 %v1439_v59 }
 0x2ee   : > { %1830 = vrot.lane.b32.xlu1 %v1829_v43, %s2963_s4 }
 0x2f3   : > { %v1782_v44 = vld [vmem:[#allocation1] sm:$0xff] }
 0x2f4   : > { %1787 = vst [vmem:[#allocation1] ss:$9 sm:$0xff] %v3253_v38  ;;  %v1786_v56 = vpack.c.bf16 %v1782_v44, %v1782_v44  ;;  %v1463_v16 = vpop.permute.xlu1 %1462  ;;  %2729 = vmatmul.msk.bf16.vlgmr.msrb.gmra.mxu0 %vm1240_vm11, %v1429_v12 }
 0x2f5   : > { %1789 = vst [vmem:[#allocation1 + $0x1] ss:$9 sm:$0xff] %v3256_v39  ;;  %v1468_v18 = vsel %vm1240_vm11, %v1463_v16, 0 }
 0x2f6   : > { %1791 = vst [vmem:[#allocation1 + $0x2] ss:$9 sm:$0xff] %v3259_v40  ;;  %v1857_v60 = vunpack.c.l.b16 %v1786_v56  ;;  %1477 = vmatpush.bf16.xpose.msrb.mxu1 %v1468_v18 }
 0x2f7   : > { %1793 = vst [vmem:[#allocation1 + $0x3] ss:$9 sm:$0xff] %v3262_v41 }
 0x2f8   : > { %1795 = vst [vmem:[#allocation1 + $0x4] ss:$9 sm:$0xff] %v3265_v42  ;;  %v1858_v14 = vpack.c.b16 %v1857_v60, %v1857_v60 }
 0x2fd   : > { %2730 = vmatmul.msk.bf16.vlgmr.msrb.gmra.mxu1 %vm1240_vm11, %v1458_v20 }
 0x2ff   : > { %v1796_v45 = vld [vmem:[#allocation1] sm:$0xff] }
 0x300   : > { %1797 = vst [vmem:[#allocation1] ss:$9 sm:$0xff] %v3290_v51  ;;  %v1805_v46 = vpack.c.bf16 %v1796_v45, %v1796_v45 }
 0x301   : > { %1798 = vst [vmem:[#allocation1 + $0x1] ss:$9 sm:$0xff] %v3293_v52 }
 0x302   : > { %1799 = vst [vmem:[#allocation1 + $0x2] ss:$9 sm:$0xff] %v3296_v53  ;;  %v1833_v47 = vunpack.c.l.b16 %v1805_v46 }
 0x303   : > { %1800 = vst [vmem:[#allocation1 + $0x3] ss:$9 sm:$0xff] %v3287_v50 }
 0x304   : > { %1801 = vst [vmem:[#allocation1 + $0x4] ss:$9 sm:$0xff] %v3299_v54  ;;  %v1834_v55 = vpack.c.b16 %v1833_v47, %v1833_v47 }
 0x306   : > { %1835 = vrot.lane.b32.xlu0 %v1834_v55, %s2964_s23 }
 0x30b   : > { %v1802_v13 = vld [vmem:[#allocation1] sm:$0xff] }
 0x30c   : > { %1807 = vst [vmem:[#allocation1] ss:$9 sm:$0xff] %v3253_v38  ;;  %v1806_v15 = vpack.c.bf16 %v1802_v13, %v1802_v13  ;;  %v2967_v13 = vmov 65535  }
 0x30d   : > { %1809 = vst [vmem:[#allocation1 + $0x1] ss:$9 sm:$0xff] %v3256_v39 }
 0x30e   : > { %1811 = vst [vmem:[#allocation1 + $0x2] ss:$9 sm:$0xff] %v3259_v40  ;;  %1859 = vrot.lane.b32.xlu0 %v1858_v14, %s2963_s4  ;;  %v1862_v19 = vunpack.c.l.b16 %v1806_v15  ;;  %v1320_v14 = vsel %vm1318_vm13, 4294967295, %v2967_v13 }
 0x30f   : > { %1813 = vst [vmem:[#allocation1 + $0x3] ss:$9 sm:$0xff] %v3262_v41  ;;  %v3501_v15 = vsel %vm1319_vm14, %v1320_v14, 0 }
 0x310   : > { %1815 = vst [vmem:[#allocation1 + $0x4] ss:$9 sm:$0xff] %v3265_v42  ;;  %v1863_v38 = vpack.c.b16 %v1862_v19, %v1862_v19 }
 0x312   : > { %1864 = vrot.lane.b32.xlu2 %v1863_v38, %s2964_s23 }
 0x317   : > { %v3458_v39 = vld [vmem:[#allocation1] sm:$0xff] }
 0x318   : > { %1817 = vst [vmem:[#allocation1] ss:$9 sm:$0xff] %v3290_v51  ;;  %v1635_v40 = vpop.permute.xlu2 %1634  ;;  %v1256_v51 = vpop.f32.mrf.mxu1 }
 0x319   : > { %1818 = vst [vmem:[#allocation1 + $0x1] ss:$9 sm:$0xff] %v3293_v52  ;;  %v1640_v41 = vsel %vm1240_vm11, %v1635_v40, 0  ;;  %v1285_v52 = vsel %vm1284_vm12, %v1256_v51, -inf }
 0x31a   : > { %1819 = vst [vmem:[#allocation1 + $0x2] ss:$9 sm:$0xff] %v3296_v53  ;;  %1649 = vmatpush.bf16.xpose.msra.mxu0 %v1640_v41 }
 0x31b   : > { %1820 = vst [vmem:[#allocation1 + $0x3] ss:$9 sm:$0xff] %v3287_v50 }
 0x31c   : > { %1821 = vst [vmem:[#allocation1 + $0x4] ss:$9 sm:$0xff] %v3299_v54 }
 0x320   : > { %v1630_v42 = vpop.permute.xlu2 %1629  ;;  %v1258_v50 = vpop.f32.mrf.mxu1 }
 0x321   : > { %2733 = vmatmul.msk.bf16.vlgmr.msra.gmra.mxu0 %vm1240_vm11, %v1630_v42  ;;  %v1280_v54 = vpop.f32.mrf.mxu2 }
 0x322   : > { %v1288_v24 = vsel %vm1284_vm12, %v1280_v54, -inf }
 0x323   : > { %1289 = vmax.xlane.f32.xlu1 %v1288_v24 }
 0x324   : > { %v1659_v53 = vpop.permute.xlu1 %1658 }
 0x329   : > { %v1282_v27 = vpop.f32.mrf.mxu2 }
 0x33b   : > { %1286 = vmax.xlane.f32.xlu2 %v1285_v52 }
 0x33c   : > { %v1664_v21 = vpop.permute.xlu0 %1663  ;;  %1312 = vrot.lane.b32.xlu1 %v1311_v34, %s2965_s27 }
 0x33d   : > { %v1669_v23 = vsel %vm1240_vm11, %v1664_v21, 0 }
 0x33e   : > { %1678 = vmatpush.bf16.xpose.msra.mxu1 %v1669_v23 }
 0x345   : > { %2734 = vmatmul.msk.bf16.vlgmr.msra.gmra.mxu1 %vm1240_vm11, %v1659_v53 }
 0x353   : > { %1341 = vrot.lane.b32.xlu2 %v1340_v28, %s2965_s27  ;;  %v1625_v28 = vpack.c.bf16 %v3425_v9, %v3425_v9  ;;  %s3720_s27 = sld [smem:[#allocation17_spill]] (!%p2778_p5) }
 0x355   : > { %v1733_v30 = vunpack.c.l.b16 %v1625_v28 }
 0x357   : > { %v1734_v34 = vpack.c.b16 %v1733_v30, %v1733_v30 }
 0x35b   : > { %1534 = vrot.lane.b32.xlu2 %v1533_v32, %s2966_s3 }
 0x360   : > { %v1831_v22 = vpop.permute.xlu1 %1830 }
 0x36c   : > { %v1865_v35 = vpop.permute.xlu2 %1864 }
 0x36d   : > { %v1870_v1 = vsel %vm1240_vm11, %v1865_v35, 0  ;;  %v1624_v35 = vpack.c.bf16 %v3418_v8, %v3418_v8 }
 0x36e   : > { %1879 = vmatpush.bf16.xpose.msrb.mxu1 %v1870_v1 }
 0x36f   : > { %v1709_v1 = vunpack.c.l.b16 %v1624_v35 }
 0x371   : > { %v1450_v0 = vpop.f32.mrf.mxu0 }
 0x372   : > { %v1483_v62 = vsel %vm1284_vm12, %v1450_v0, -inf }
 0x373   : > { %1484 = vmax.xlane.f32.xlu0 %v1483_v62 }
 0x378   : > { %v1836_v36 = vpop.permute.xlu0 %1835 }
 0x379   : > { %v1841_v37 = vsel %vm1240_vm11, %v1836_v36, 0  ;;  %v1452_v63 = vpop.f32.mrf.mxu0  ;;  %v1710_v36 = vpack.c.b16 %v1709_v1, %v1709_v1 }
 0x37a   : > { %1850 = vmatpush.bf16.xpose.msrb.mxu0 %v1841_v37  ;;  %v1479_v2 = vpop.f32.mrf.mxu1 }
 0x37b   : > { %v1486_v3 = vsel %vm1284_vm12, %v1479_v2, -inf }
 0x380   : > { %v1860_v49 = vpop.permute.xlu0 %1859 }
 0x381   : > { %2737 = vmatmul.msk.bf16.vlgmr.msrb.gmra.mxu0 %vm1240_vm11, %v1831_v22  ;;  %2738 = vmatmul.msk.bf16.vlgmr.msrb.gmra.mxu1 %vm1240_vm11, %v1860_v49 }
 0x382   : > { %v1481_v5 = vpop.f32.mrf.mxu1 }
 0x384   : > { %1487 = vmax.xlane.f32.xlu2 %v1486_v3 }
 0x387   : > { %1510 = vrot.lane.b32.xlu0 %v1509_v6, %s2966_s3  ;;  %s3717_s3 = scalar_lea.vmem %s3679_s14, %s3096_s26 }
 0x396   : > { %v1290_v47 = vpop.xlane.xlu1 %1289 }
 0x397   : > { %v1292_v55 = vsub.f32 %v1280_v54, %v1290_v47 }
 0x399   : > { %v1295_v56 = vmul.f32 1.442695, %v1292_v55 }
 0x39e   : > { %v3485_v7 = vpop.f32.mrf.mxu0 }
 0x39f   : > { %v1684_v61 = vsel %vm1284_vm12, %v3485_v7, -inf }
 0x3a0   : > { %1685 = vmax.xlane.f32.xlu1 %v1684_v61 }
 0x3a6   : > { %v1653_v10 = vpop.f32.mrf.mxu0 }
 0x3ae   : > { %v1287_v11 = vpop.xlane.xlu2 %1286  ;;  %v1313_v18 = vpop.permute.xlu1 %1312 }
 0x3af   : > { %v1291_v43 = vsub.f32 %v1256_v51, %v1287_v11  ;;  %v1323_v19 = vand.u32 %v3501_v15, %v1313_v18  ;;  %v1822_v11 = vld [vmem:[#allocation1] sm:$0xff] }
 0x3b1   : > { %v1293_v44 = vmul.f32 1.442695, %v1291_v43  ;;  %1332 = vmatpush.bf16.msra.mxu3 %v1323_v19 }
 0x3b3   : > { %2870 = vpow2.f32 %v1293_v44  ;;  %v1826_v44 = vpack.c.bf16 %v1822_v11, %v1822_v11 }
 0x3b4   : > { %2872 = vpow2.f32 %v1295_v56 }
 0x3b6   : > { %v1342_v16 = vpop.permute.xlu2 %1341 }
 0x3b7   : > { %v1347_v38 = vand.u32 %v1342_v16, %v3501_v15 }
 0x3b9   : > { %v3489_v45 = vpop.eup %2870  ;;  %1356 = vmatpush.bf16.msrb.mxu3 %v1347_v38 }
 0x3ba   : > { %v1297_v17 = vsel %vm1284_vm12, %v3489_v45, 0.0  ;;  %v3497_v60 = vpop.eup %2872 }
 0x3bb   : > { %1298 = vadd.xlane.f32.xlu2 %v1297_v17  ;;  %v1300_v12 = vsel %vm1284_vm12, %v3497_v60, 0.0 }
 0x3be   : > { %v1535_v41 = vpop.permute.xlu2 %1534 }
 0x3bf   : > { %v1540_v57 = vand.u32 %v1535_v41, %v3501_v15 }
 0x3c2   : > { %v3491_v46 = vpop.f32.mrf.mxu1 }
 0x3c3   : > { %v1687_v58 = vsel %vm1284_vm12, %v3491_v46, -inf }
 0x3c4   : > { %1688 = vmax.xlane.f32.xlu0 %v1687_v58 }
 0x3ca   : > { %v1682_v59 = vpop.f32.mrf.mxu1 }
 0x3cc   : > { %1301 = vadd.xlane.f32.xlu0 %v1300_v12 }
 0x3e6   : > { %v1485_v23 = vpop.xlane.xlu0 %1484 }
 0x3e7   : > { %v1489_v51 = vsub.f32 %v1450_v0, %v1485_v23 }
 0x3e9   : > { %v1491_v52 = vmul.f32 1.442695, %v1489_v51 }
 0x3eb   : > { %2874 = vpow2.f32 %v1491_v52 }
 0x3f1   : > { %v3513_v25 = vpop.eup %2874 }
 0x3f2   : > { %v1495_v27 = vsel %vm1284_vm12, %v3513_v25, 0.0 }
 0x3f7   : > { %v1488_v54 = vpop.xlane.xlu2 %1487 }
 0x3f8   : > { %v1490_v24 = vsub.f32 %v1479_v2, %v1488_v54 }
 0x3f9   : > { %v1511_v31 = vpop.permute.xlu0 %1510 }
 0x3fa   : > { %v1493_v26 = vmul.f32 1.442695, %v1490_v24  ;;  %v1516_v32 = vand.u32 %v1511_v31, %v3501_v15 }
 0x3fc   : > { %2876 = vpow2.f32 %v1493_v26  ;;  %1525 = vmatpush.bf16.msrb.mxu2 %v1516_v32 }
 0x3fe   : > { %v3505_v20 = vpop.f32.mrf.mxu0  ;;  %v3507_v40 = vpop.f32.mrf.mxu1 }
 0x3ff   : > { %v1888_v42 = vsel %vm1284_vm12, %v3507_v40, -inf  ;;  %v1885_v21 = vsel %vm1284_vm12, %v3505_v20, -inf }
 0x400   : > { %1889 = vmax.xlane.f32.xlu2 %v1888_v42  ;;  %1886 = vmax.xlane.f32.xlu0 %v1885_v21  ;;  %v1825_v21 = vpack.c.bf16 %v3458_v39, %v3458_v39 }
 0x402   : > { %v3519_v29 = vpop.eup %2876  ;;  %v1910_v51 = vunpack.c.l.b16 %v1825_v21 }
 0x403   : > { %v1498_v33 = vsel %vm1284_vm12, %v3519_v29, 0.0 }
 0x404   : > { %1499 = vadd.xlane.f32.xlu1 %v1498_v33 }
 0x406   : > { %v1854_v53 = vpop.f32.mrf.mxu0  ;;  %v1883_v50 = vpop.f32.mrf.mxu1 }
 0x407   : > { %v1911_v50 = vpack.c.b16 %v1910_v51, %v1910_v51  ;;  %v2859_v51 = vld [vmem:[%s3716_s30] ss:$0 sm:$0xff]  ;;  %s3719_s30 = sld [smem:[#allocation16_spill]] (!%p2778_p5) }
 0x408   : > { %1496 = vadd.xlane.f32.xlu0 %v1495_v27 }
 0x413   : > { %v1686_v9 = vpop.xlane.xlu1 %1685 }
 0x414   : > { %v1690_v37 = vsub.f32 %v3485_v7, %v1686_v9 }
 0x416   : > { %v1692_v22 = vmul.f32 1.442695, %v1690_v37 }
 0x418   : > { %1735 = vrot.lane.b32.xlu2 %v1734_v34, %s2968_s21  ;;  %2878 = vpow2.f32 %v1692_v22 }
 0x41d   : > { %1711 = vrot.lane.b32.xlu1 %v1710_v36, %s2968_s21 }
 0x41e   : > { %v3527_v0 = vpop.eup %2878 }
 0x41f   : > { %v1696_v8 = vsel %vm1284_vm12, %v3527_v0, 0.0 }
 0x42e   : > { %v1299_v49 = vpop.xlane.xlu2 %1298 }
 0x42f   : > { %2880 = vrcp.f32 %v1299_v49 }
 0x435   : > { %v2881_v63 = vpop.eup %2880 }
 0x436   : > { %v1305_v3 = vmul.f32 %v2881_v63, %v3489_v45 }
 0x437   : > { %v1689_v62 = vpop.xlane.xlu0 %1688 }
 0x438   : > { %v1691_v2 = vsub.f32 %v3491_v46, %v1689_v62  ;;  %v1307_v5 = vpack.c.bf16 %v1305_v3, %v1305_v3  ;;  %v1934_v46 = vunpack.c.l.b16 %v1826_v44 }
 0x43a   : > { %v1694_v4 = vmul.f32 1.442695, %v1691_v2  ;;  %2727 = vmatmul.msk.bf16.vlgmr.msra.gmra.mxu3 %vm1314_vm15, %v1307_v5  ;;  %v1935_v17 = vpack.c.b16 %v1934_v46, %v1934_v46 }
 0x43b   : > { %1549 = vmatpush.bf16.msra.mxu3 %v1540_v57 }
 0x43c   : > { %2882 = vpow2.f32 %v1694_v4 }
 0x43f   : > { %v1302_v6 = vpop.xlane.xlu0 %1301 }
 0x440   : > { %2884 = vrcp.f32 %v1302_v6 }
 0x441   : > { %1697 = vadd.xlane.f32.xlu2 %v1696_v8 }
 0x442   : > { %v2883_v7 = vpop.eup %2882 }
 0x443   : > { %v1699_v61 = vsel %vm1284_vm12, %v2883_v7, 0.0 }
 0x444   : > { %1700 = vadd.xlane.f32.xlu0 %v1699_v61 }
 0x446   : > { %v2885_v10 = vpop.eup %2884 }
 0x447   : > { %v1306_v43 = vmul.f32 %v2885_v10, %v3497_v60 }
 0x449   : > { %v1308_v45 = vpack.c.bf16 %v1306_v43, %v1306_v43 }
 0x44b   : > { %2728 = vmatmul.msk.bf16.vlgmr.msrb.gmra.mxu3 %vm1314_vm15, %v1308_v45 }
 0x459   : > { %1936 = vrot.lane.b32.xlu2 %v1935_v17, %s2969_s2 }
 0x473   : > { %v1890_v47 = vpop.xlane.xlu2 %1889  ;;  %v1887_v55 = vpop.xlane.xlu0 %1886 }
 0x474   : > { %v1892_v56 = vsub.f32 %v3507_v40, %v1890_v47  ;;  %v1891_v58 = vsub.f32 %v3505_v20, %v1887_v55 }
 0x476   : > { %v1895_v59 = vmul.f32 1.442695, %v1892_v56  ;;  %v1893_v12 = vmul.f32 1.442695, %v1891_v58  ;;  %v2815_v58 = vld [vmem:[%s3119_s20 + $0x8] sm:$0xff] }
 0x477   : > { %v1500_v41 = vpop.xlane.xlu1 %1499  ;;  %2031 = vmatpush.bf16.msra.mxu0 %v2815_v58 }
 0x478   : > { %2886 = vpow2.f32 %v1895_v59  ;;  %v2814_v59 = vld [vmem:[%s3119_s20] sm:$0xff] }
 0x479   : > { %2888 = vpow2.f32 %v1893_v12 }
 0x47b   : > { %v1736_v60 = vpop.permute.xlu2 %1735  ;;  %v1497_v19 = vpop.xlane.xlu0 %1496  ;;  %2032 = vmatpush.bf16.msra.mxu0 %v2814_v59  ;;  %v2860_v59 = vld [vmem:[%s795_s18] ss:$0 sm:$0xff] }
 0x47c   : > { %v1741_v13 = vand.u32 %v1736_v60, %v3501_v15  ;;  %2890 = vrcp.f32 %v1497_v19 }
 0x47d   : > { %2892 = vrcp.f32 %v1500_v41 }
 0x47e   : > { %v2887_v14 = vpop.eup %2886  ;;  %1750 = vmatpush.bf16.msrb.mxu3 %v1741_v13 }
 0x47f   : > { %v2889_v16 = vpop.eup %2888  ;;  %v1900_v18 = vsel %vm1284_vm12, %v2887_v14, 0.0 }
 0x480   : > { %1901 = vadd.xlane.f32.xlu1 %v1900_v18  ;;  %v1897_v38 = vsel %vm1284_vm12, %v2889_v16, 0.0 }
 0x481   : > { %1898 = vadd.xlane.f32.xlu0 %v1897_v38 }
 0x482   : > { %v2891_v40 = vpop.eup %2890 }
 0x483   : > { %v1503_v20 = vmul.f32 %v2891_v40, %v3513_v25  ;;  %v2893_v23 = vpop.eup %2892 }
 0x484   : > { %v1504_v52 = vmul.f32 %v2893_v23, %v3519_v29 }
 0x485   : > { %v1505_v42 = vpack.c.bf16 %v1503_v20, %v1503_v20 }
 0x486   : > { %v1506_v53 = vpack.c.bf16 %v1504_v52, %v1504_v52 }
 0x487   : > { %2731 = vmatmul.msk.bf16.vlgmr.msrb.gmra.mxu2 %vm1314_vm15, %v1505_v42 }
 0x488   : > { %2732 = vmatmul.msk.bf16.vlgmr.msra.gmra.mxu3 %vm1314_vm15, %v1506_v53 }
 0x48f   : > { %v1712_v54 = vpop.permute.xlu1 %1711 }
 0x490   : > { %v1717_v24 = vand.u32 %v1712_v54, %v3501_v15 }
 0x492   : > { %1726 = vmatpush.bf16.msra.mxu2 %v1717_v24 }
 0x495   : > { %1912 = vrot.lane.b32.xlu0 %v1911_v50, %s2969_s2  ;;  %s3718_s2 = scalar_lea.vmem %s3681_s16, %s3096_s26 }
 0x4b4   : > { %v1698_v25 = vpop.xlane.xlu2 %1697 }
 0x4b5   : > { %2894 = vrcp.f32 %v1698_v25 }
 0x4b7   : > { %v1701_v30 = vpop.xlane.xlu0 %1700 }
 0x4b8   : > { %2896 = vrcp.f32 %v1701_v30 }
 0x4bb   : > { %v2895_v26 = vpop.eup %2894 }
 0x4bc   : > { %v1704_v39 = vmul.f32 %v2895_v26, %v3527_v0  ;;  %v1937_v27 = vpop.permute.xlu2 %1936 }
 0x4bd   : > { %v1942_v28 = vand.u32 %v1937_v27, %v3501_v15  ;;  %v1334_v33 = vpop.f32.mrf.mxu3 }
 0x4be   : > { %v1706_v29 = vpack.c.bf16 %v1704_v39, %v1704_v39  ;;  %v2897_v31 = vpop.eup %2896  ;;  %1363 = vst.msk [vmem:[#allocation3] sm:$0x1f] %vm1362_vm0, %v1334_v33 }
 0x4bf   : > { %1951 = vmatpush.bf16.msra.mxu3 %v1942_v28  ;;  %v1705_v32 = vmul.f32 %v2897_v31, %v2883_v7 }
 0x4c0   : > { %2735 = vmatmul.msk.bf16.vlgmr.msra.gmra.mxu2 %vm1314_vm15, %v1706_v29 }
 0x4c1   : > { %v1707_v34 = vpack.c.bf16 %v1705_v32, %v1705_v32  ;;  %v2910_v32 = vld [vmem:[#allocation2] sm:$0x1f] }
 0x4c3   : > { %2736 = vmatmul.msk.bf16.vlgmr.msrb.gmra.mxu3 %vm1314_vm15, %v1707_v34 }
 0x4c5   : > { %v1336_v35 = vpop.f32.mrf.mxu3 }
 0x4ce   : > { %v1358_v1 = vpop.f32.mrf.mxu3 }
 0x4cf   : > { %1364 = vst.msk [vmem:[#allocation3 + $0x8] sm:$0x1f] %vm1362_vm0, %v1358_v1 }
 0x4d6   : > { %v1360_v36 = vpop.f32.mrf.mxu3 }
 0x4f3   : > { %v1902_v9 = vpop.xlane.xlu1 %1901 }
 0x4f4   : > { %2898 = vrcp.f32 %v1902_v9  ;;  %v1899_v22 = vpop.xlane.xlu0 %1898  ;;  %v2911_v9 = vld [vmem:[#allocation2 + $0x8] sm:$0x1f] }
 0x4f5   : > { %2900 = vrcp.f32 %v1899_v22 }
 0x4fa   : > { %v2899_v37 = vpop.eup %2898 }
 0x4fb   : > { %v1906_v49 = vmul.f32 %v2899_v37, %v2887_v14  ;;  %v2901_v62 = vpop.eup %2900 }
 0x4fc   : > { %v1905_v63 = vmul.f32 %v2901_v62, %v2889_v16 }
 0x4fd   : > { %v1908_v0 = vpack.c.bf16 %v1906_v49, %v1906_v49 }
 0x4fe   : > { %v1907_v8 = vpack.c.bf16 %v1905_v63, %v1905_v63 }
 0x4ff   : > { %2740 = vmatmul.msk.bf16.vlgmr.msra.gmra.mxu3 %vm1314_vm15, %v1908_v0 }
 0x507   : > { %v1913_v2 = vpop.permute.xlu0 %1912 }
 0x508   : > { %v1918_v3 = vand.u32 %v1913_v2, %v3501_v15 }
 0x50a   : > { %1927 = vmatpush.bf16.msrb.mxu2 %v1918_v3  ;;  %v1527_v4 = vpop.f32.mrf.mxu2 }
 0x50b   : > { %1557 = vrot.lane.b32.xlu0 %v1527_v4, %s2970_s17  ;;  %v1551_v57 = vpop.f32.mrf.mxu3 }
 0x50c   : > { %1559 = vrot.lane.b32.xlu2 %v1551_v57, %s2970_s17 }
 0x50d   : > { %2739 = vmatmul.msk.bf16.vlgmr.msrb.gmra.mxu2 %vm1314_vm15, %v1907_v8 }
 0x512   : > { %v1529_v5 = vpop.f32.mrf.mxu2 }
 0x513   : > { %v1553_v6 = vpop.f32.mrf.mxu3 }
 0x543   : > { %v1728_v7 = vpop.f32.mrf.mxu2 }
 0x544   : > { %1758 = vrot.lane.b32.xlu0 %v1728_v7, %s2971_s9 }
 0x546   : > { %v1752_v10 = vpop.f32.mrf.mxu3 }
 0x547   : > { %1760 = vrot.lane.b32.xlu2 %v1752_v10, %s2971_s9 }
 0x54b   : > { %v1730_v61 = vpop.f32.mrf.mxu2 }
 0x54e   : > { %v1754_v11 = vpop.f32.mrf.mxu3 }
 0x566   : > { %v1560_v15 = vpop.permute.xlu2 %1559 }
 0x567   : > { %1565 = vst.msk [vmem:[#allocation3 + $0x8] sm:$0x1f] %vm1563_vm1, %v1560_v15 }
 0x57d   : > { %v1558_v43 = vpop.permute.xlu0 %1557 }
 0x57e   : > { %1564 = vst.msk [vmem:[#allocation3] sm:$0x1f] %vm1563_vm1, %v1558_v43  ;;  %v2817_v43 = vld [vmem:[%s3136_s7 + $0x8] sm:$0xff] }
 0x57f   : > { %2190 = vmatpush.bf16.msra.mxu1 %v2817_v43 }
 0x582   : > { %v1953_v44 = vpop.f32.mrf.mxu3 }
 0x583   : > { %1961 = vrot.lane.b32.xlu1 %v1953_v44, %s2972_s29 }
 0x58a   : > { %v1955_v45 = vpop.f32.mrf.mxu3 }
 0x590   : > { %v1929_v46 = vpop.f32.mrf.mxu2 }
 0x591   : > { %1959 = vrot.lane.b32.xlu0 %v1929_v46, %s2972_s29  ;;  %v2816_v46 = vld [vmem:[%s3136_s7] sm:$0xff] }
 0x592   : > { %2191 = vmatpush.bf16.msra.mxu1 %v2816_v46  ;;  %v2820_v46 = vld [vmem:[%s3146_s0 + $0x10] sm:$0xff] }
 0x598   : > { %v1931_v17 = vpop.f32.mrf.mxu2 }
 0x5a1   : > { %v1761_v47 = vpop.permute.xlu2 %1760 }
 0x5a2   : > { %1766 = vst.msk [vmem:[#allocation3 + $0x8] sm:$0x1f] %vm1764_vm3, %v1761_v47 }
 0x5b6   : > { %v1759_v55 = vpop.permute.xlu0 %1758 }
 0x5b7   : > { %1765 = vst.msk [vmem:[#allocation3] sm:$0x1f] %vm1764_vm3, %v1759_v55 }
 0x5f5   : > { %v1962_v56 = vpop.permute.xlu1 %1961 }
 0x5f6   : > { %1967 = vst.msk [vmem:[#allocation3 + $0x8] sm:$0x1f] %vm1965_vm4, %v1962_v56 }
 0x5fd   : > { %v1969_v12 = vld [vmem:[#allocation3 + $0x8] sm:$0x1f] }
 0x5fe   : > { %v1976_v60 = vrot.slane %v1969_v12, 1  ;;  %v1977_v13 = vrot.slane %v1969_v12, 2  ;;  %1990 = vst [vmem:[#allocation1 + $0x5] ss:$9 sm:$0xff] %v1969_v12  ;;  %v1978_v20 = vrot.slane %v1969_v12, 3  ;;  %v1979_v41 = vrot.slane %v1969_v12, 4 }
 0x600   : > { %1992 = vst [vmem:[#allocation1 + $0x6] ss:$9 sm:$0xff] %v1976_v60 }
 0x601   : > { %1994 = vst [vmem:[#allocation1 + $0x7] ss:$9 sm:$0xff] %v1977_v13  ;;  %v2861_v13 = vld [vmem:[%s798_s1] ss:$0 sm:$0xff]  ;;  %s3721_s1 = sld [smem:[#allocation18_spill]] (!%p2778_p5) }
 0x603   : > { %v1960_v14 = vpop.permute.xlu0 %1959 }
 0x604   : > { %1966 = vst.msk [vmem:[#allocation3] sm:$0x1f] %vm1965_vm4, %v1960_v14 }
 0x60b   : > { %v1968_v16 = vld [vmem:[#allocation3] sm:$0x1f] }
 0x60c   : > { %v1972_v18 = vrot.slane %v1968_v16, 1  ;;  %v1973_v19 = vrot.slane %v1968_v16, 2  ;;  %v1974_v38 = vrot.slane %v1968_v16, 3  ;;  %1980 = vst [vmem:[#allocation1] ss:$9 sm:$0xff] %v1968_v16  ;;  %v1975_v40 = vrot.slane %v1968_v16, 4 }
 0x60e   : > { %1982 = vst [vmem:[#allocation1 + $0x1] ss:$9 sm:$0xff] %v1972_v18 }
 0x60f   : > { %1984 = vst [vmem:[#allocation1 + $0x2] ss:$9 sm:$0xff] %v1973_v19 }
 0x610   : > { %1986 = vst [vmem:[#allocation1 + $0x3] ss:$9 sm:$0xff] %v1974_v38 }
 0x611   : > { %1988 = vst [vmem:[#allocation1 + $0x4] ss:$9 sm:$0xff] %v1975_v40 }
 0x618   : > { %v1995_v42 = vld [vmem:[#allocation1] sm:$0xff] }
 0x619   : > { %1996 = vst [vmem:[#allocation1] ss:$9 sm:$0xff] %v1978_v20 }
 0x61a   : > { %1997 = vst [vmem:[#allocation1 + $0x1] ss:$9 sm:$0xff] %v1979_v41 }
 0x621   : > { %v1998_v21 = vld [vmem:[#allocation1] sm:$0xff] }
 0x622   : > { %v2001_v23 = vpack.c.bf16 %v1998_v21, %v1995_v42 }
 0x624   : > { %2749 = vmatmul.msk.bf16.vlgmr.msra.gmra.mxu0 %vm1119_vm10, %v2001_v23 }
 0x6a1   : > { %v2034_v52 = vpop.f32.mrf.mxu0 }
 0x6a2   : > { %v2035_v53 = vadd.f32 %v2859_v51, %v2034_v52 }
 0x6a4   : > { %v2041_v50 = vrot.slane %v2035_v53, 1  ;;  %v2042_v54 = vrot.slane %v2035_v53, 2  ;;  %v2043_v24 = vrot.slane %v2035_v53, 3  ;;  %2049 = vst [vmem:[#allocation1] ss:$9 sm:$0xff] %v2035_v53  ;;  %v2044_v25 = vrot.slane %v2035_v53, 4 }
 0x6a5   : > { %v2045_v27 = vrot.slane %v2035_v53, 5  ;;  %v2046_v28 = vrot.slane %v2035_v53, 6  ;;  %v2047_v29 = vrot.slane %v2035_v53, 7 }
 0x6a6   : > { %2051 = vst [vmem:[#allocation1 + $0x1] ss:$9 sm:$0xff] %v2041_v50 }
 0x6a7   : > { %2053 = vst [vmem:[#allocation1 + $0x2] ss:$9 sm:$0xff] %v2042_v54 }
 0x6a8   : > { %2055 = vst [vmem:[#allocation1 + $0x3] ss:$9 sm:$0xff] %v2043_v24 }
 0x6a9   : > { %2057 = vst [vmem:[#allocation1 + $0x4] ss:$9 sm:$0xff] %v2044_v25  ;;  %v2036_v26 = vpop.f32.mrf.mxu0 }
 0x6aa   : > { %v2037_v39 = vadd.f32 %v2859_v51, %v2036_v26 }
 0x6ac   : > { %v2048_v31 = vrot.slane %v2037_v39, 1 }
 0x6b0   : > { %v2058_v30 = vld [vmem:[#allocation1] sm:$0xff] }
 0x6b1   : > { %v3567_v33 = vadd.f32 %v2910_v32, %v2058_v30  ;;  %2059 = vst [vmem:[#allocation1] ss:$9 sm:$0xff] %v2045_v27 }
 0x6b2   : > { %2060 = vst [vmem:[#allocation1 + $0x1] ss:$9 sm:$0xff] %v2046_v28 }
 0x6b3   : > { %v2071_v34 = vsel %vm1001_vm2, %v3567_v33, 0.0  ;;  %2061 = vst [vmem:[#allocation1 + $0x2] ss:$9 sm:$0xff] %v2047_v29  ;;  %v2079_v35 = vmul.f32 %v3567_v33, %v3567_v33 }
 0x6b4   : > { %2072 = vadd.xlane.f32.xlu2 %v2071_v34  ;;  %2062 = vst [vmem:[#allocation1 + $0x3] ss:$9 sm:$0xff] %v2037_v39 }
 0x6b5   : > { %2063 = vst [vmem:[#allocation1 + $0x4] ss:$9 sm:$0xff] %v2048_v31  ;;  %v2081_v1 = vsel %vm1001_vm2, %v2079_v35, 0.0  ;;  %v2862_v31 = vld [vmem:[%s3717_s3] ss:$0 sm:$0xff] }
 0x6b6   : > { %2082 = vadd.xlane.f32.xlu1 %v2081_v1 }
 0x6bc   : > { %v2064_v36 = vld [vmem:[#allocation1] sm:$0xff] }
 0x6bd   : > { %v3574_v37 = vadd.f32 %v2911_v9, %v2064_v36 }
 0x6bf   : > { %v2074_v22 = vsel %vm1001_vm2, %v3574_v37, 0.0  ;;  %v2080_v49 = vmul.f32 %v3574_v37, %v3574_v37 }
 0x6c0   : > { %2075 = vadd.xlane.f32.xlu0 %v2074_v22 }
 0x6c1   : > { %v2084_v0 = vsel %vm1001_vm2, %v2080_v49, 0.0 }
 0x6c2   : > { %2085 = vadd.xlane.f32.xlu2 %v2084_v0 }
 0x727   : > { %v2073_v62 = vpop.xlane.xlu2 %2072 }
 0x728   : > { %v2077_v63 = vmul.f32 %v2073_v62, %v3228_v48 }
 0x729   : > { %v2083_v2 = vpop.xlane.xlu1 %2082 }
 0x72a   : > { %v2089_v3 = vmul.f32 %v2077_v63, %v2077_v63  ;;  %v2087_v8 = vmul.f32 %v2083_v2, %v3228_v48  ;;  %v2093_v58 = vsub.f32 %v3567_v33, %v2077_v63 }
 0x72c   : > { %v2091_v4 = vsub.f32 %v2087_v8, %v2089_v3 }
 0x72e   : > { %v2095_v5 = vadd.f32 1e-05, %v2091_v4 }
 0x730   : > { %2902 = vrsqrt.f32 %v2095_v5  ;;  %vm2103_vm6 = vweird.f32 %v2095_v5 }
 0x733   : > { %v2076_v57 = vpop.xlane.xlu0 %2075 }
 0x734   : > { %v2078_v6 = vmul.f32 %v2076_v57, %v3228_v48 }
 0x735   : > { %v2086_v7 = vpop.xlane.xlu2 %2085 }
 0x736   : > { %v2903_v61 = vpop.eup %2902  ;;  %v2090_v10 = vmul.f32 %v2078_v6, %v2078_v6  ;;  %v2088_v11 = vmul.f32 %v2086_v7, %v3228_v48  ;;  %v2094_v52 = vsub.f32 %v3574_v37, %v2078_v6  ;;  %v2821_v7 = vld [vmem:[%s3146_s0 + $0x18] sm:$0xff] }
 0x737   : > { %v2098_v15 = vmul.f32 %v2903_v61, %v2095_v5  ;;  %vm2104_vm5 = vweird.f32 %v2903_v61  ;;  %2331 = vmatpush.bf16.msra.mxu2 %v2821_v7 }
 0x738   : > { %v2092_v44 = vsub.f32 %v2088_v11, %v2090_v10  ;;  %vm2105_vm7 = vmor %vm2103_vm6, %vm2104_vm5  ;;  %vm2323_vm5 = vcmask 523264  }
 0x739   : > { %v2099_v45 = vmul.f32 %v2903_v61, %v2098_v15 }
 0x73a   : > { %v2096_v17 = vadd.f32 1e-05, %v2092_v44 }
 0x73b   : > { %v2100_v47 = vmul.f32 0.5, %v2099_v45  ;;  %2332 = vmatpush.bf16.msra.mxu2 %v2820_v46 }
 0x73c   : > { %2904 = vrsqrt.f32 %v2096_v17  ;;  %vm2113_vm9 = vweird.f32 %v2096_v17 }
 0x73d   : > { %v2101_v55 = vsub.f32 1.5, %v2100_v47 }
 0x73f   : > { %v2102_v56 = vmul.f32 %v2903_v61, %v2101_v55 }
 0x741   : > { %v2106_v12 = vsel %vm2105_vm7, %v2903_v61, %v2102_v56 }
 0x742   : > { %v2905_v60 = vpop.eup %2904  ;;  %v2117_v14 = vmul.f32 %v2106_v12, %v2093_v58 }
 0x743   : > { %v2108_v16 = vmul.f32 %v2905_v60, %v2096_v17  ;;  %vm2114_vm8 = vweird.f32 %v2905_v60 }
 0x744   : > { %v2122_v18 = vmul.f32 %v2860_v59, %v2117_v14  ;;  %vm2115_vm11 = vmor %vm2113_vm9, %vm2114_vm8 }
 0x745   : > { %v2109_v19 = vmul.f32 %v2905_v60, %v2108_v16 }
 0x746   : > { %v2127_v38 = vadd.f32 %v2861_v13, %v2122_v18 }
 0x747   : > { %v2110_v40 = vmul.f32 0.5, %v2109_v19 }
 0x748   : > { %v2131_v20 = vrot.slane %v2127_v38, 1  ;;  %v2132_v41 = vrot.slane %v2127_v38, 2  ;;  %v2133_v42 = vrot.slane %v2127_v38, 3  ;;  %2139 = vst [vmem:[#allocation1] ss:$9 sm:$0xff] %v2127_v38  ;;  %v2134_v21 = vrot.slane %v2127_v38, 4 }
 0x749   : > { %v2111_v23 = vsub.f32 1.5, %v2110_v40  ;;  %v2818_v38 = vld [vmem:[%s3146_s0] sm:$0xff] }
 0x74a   : > { %2141 = vst [vmem:[#allocation1 + $0x1] ss:$9 sm:$0xff] %v2131_v20 }
 0x74b   : > { %2143 = vst [vmem:[#allocation1 + $0x2] ss:$9 sm:$0xff] %v2132_v41  ;;  %v2112_v51 = vmul.f32 %v2905_v60, %v2111_v23 }
 0x74c   : > { %2145 = vst [vmem:[#allocation1 + $0x3] ss:$9 sm:$0xff] %v2133_v42 }
 0x74d   : > { %2147 = vst [vmem:[#allocation1 + $0x4] ss:$9 sm:$0xff] %v2134_v21  ;;  %v2116_v53 = vsel %vm2115_vm11, %v2905_v60, %v2112_v51  ;;  %v2819_v60 = vld [vmem:[%s3146_s0 + $0x8] sm:$0xff] }
 0x74e   : > { %v2118_v50 = vmul.f32 %v2116_v53, %v2094_v52  ;;  %2333 = vmatpush.bf16.msra.mxu2 %v2819_v60 }
 0x750   : > { %v2123_v54 = vmul.f32 %v2860_v59, %v2118_v50 }
 0x752   : > { %v2128_v24 = vadd.f32 %v2861_v13, %v2123_v54  ;;  %2334 = vmatpush.bf16.msra.mxu2 %v2818_v38 }
 0x754   : > { %v2135_v25 = vrot.slane %v2128_v24, 1  ;;  %v2136_v26 = vrot.slane %v2128_v24, 2  ;;  %2149 = vst [vmem:[#allocation1 + $0x5] ss:$9 sm:$0xff] %v2128_v24  ;;  %v2137_v39 = vrot.slane %v2128_v24, 3  ;;  %v2138_v27 = vrot.slane %v2128_v24, 4 }
 0x756   : > { %2151 = vst [vmem:[#allocation1 + $0x6] ss:$9 sm:$0xff] %v2135_v25 }
 0x757   : > { %2153 = vst [vmem:[#allocation1 + $0x7] ss:$9 sm:$0xff] %v2136_v26 }
 0x75e   : > { %v2154_v28 = vld [vmem:[#allocation1] sm:$0xff] }
 0x75f   : > { %2155 = vst [vmem:[#allocation1] ss:$9 sm:$0xff] %v2137_v39 }
 0x760   : > { %2156 = vst [vmem:[#allocation1 + $0x1] ss:$9 sm:$0xff] %v2138_v27 }
 0x767   : > { %v2157_v30 = vld [vmem:[#allocation1] sm:$0xff] }
 0x768   : > { %v2160_v29 = vpack.c.bf16 %v2157_v30, %v2154_v28 }
 0x76a   : > { %2758 = vmatmul.msk.bf16.vlgmr.msra.gmra.mxu1 %vm1119_vm10, %v2160_v29 }
 0x7e7   : > { %v2193_v32 = vpop.f32.mrf.mxu1 }
 0x7e8   : > { %v3605_v34 = vadd.f32 %v2862_v31, %v2193_v32 }
 0x7ea   : > { %v3608_v35 = vmul.f32 0.70710677, %v3605_v34 }
 0x7ec   : > { %v2202_v1 = vmul.f32 %v3608_v35, %v3608_v35 }
 0x7ee   : > { %v2203_v36 = vmin.f32 %v2202_v1, 16.0 }
 0x7ef   : > { %v2195_v9 = vpop.f32.mrf.mxu1 }
 0x7f0   : > { %v2204_v22 = vmul.f32 2.1237322e-06, %v2203_v36  ;;  %v2215_v49 = vmul.f32 3.8918573e-05, %v2203_v36  ;;  %v3612_v0 = vadd.f32 %v2862_v31, %v2195_v9 }
 0x7f2   : > { %v2205_v62 = vadd.f32 0.00028619796, %v2204_v22  ;;  %v2216_v63 = vadd.f32 0.001143296, %v2215_v49  ;;  %v3615_v2 = vmul.f32 0.70710677, %v3612_v0 }
 0x7f4   : > { %v2217_v3 = vmul.f32 %v2216_v63, %v2203_v36  ;;  %v2242_v8 = vmul.f32 %v3615_v2, %v3615_v2  ;;  %v2206_v4 = vmul.f32 %v2205_v62, %v2203_v36 }
 0x7f6   : > { %v2218_v5 = vadd.f32 0.014752088, %v2217_v3  ;;  %v2243_v57 = vmin.f32 %v2242_v8, 16.0  ;;  %v2207_v11 = vadd.f32 0.0036580483, %v2206_v4 }
 0x7f8   : > { %v2219_v6 = vmul.f32 %v2218_v5, %v2203_v36  ;;  %v2244_v61 = vmul.f32 2.1237322e-06, %v2243_v57  ;;  %v2255_v10 = vmul.f32 3.8918573e-05, %v2243_v57  ;;  %v2208_v55 = vmul.f32 %v2207_v11, %v2203_v36 }
 0x7fa   : > { %v2220_v15 = vadd.f32 0.112945676, %v2219_v6  ;;  %v2245_v43 = vadd.f32 0.00028619796, %v2244_v61  ;;  %v2256_v44 = vadd.f32 0.001143296, %v2255_v10 }
 0x7fb   : > { %v2209_v14 = vadd.f32 0.05243302, %v2208_v55 }
 0x7fc   : > { %v2221_v45 = vmul.f32 %v2220_v15, %v2203_v36  ;;  %v2246_v17 = vmul.f32 %v2245_v43, %v2243_v57  ;;  %v2257_v47 = vmul.f32 %v2256_v44, %v2243_v57  ;;  %v2198_v43 = vmul.f32 0.5, %v3605_v34 }
 0x7fd   : > { %v2210_v20 = vmul.f32 %v2209_v14, %v2203_v36  ;;  %v2199_v44 = vmul.f32 0.5, %v3612_v0 }
 0x7fe   : > { %v2222_v56 = vadd.f32 0.4994258, %v2221_v45  ;;  %v2247_v58 = vadd.f32 0.0036580483, %v2246_v17  ;;  %v2258_v59 = vadd.f32 0.014752088, %v2257_v47 }
 0x7ff   : > { %v2211_v51 = vadd.f32 0.18741608, %v2210_v20 }
 0x800   : > { %v2223_v12 = vmul.f32 %v2222_v56, %v2203_v36  ;;  %v2259_v13 = vmul.f32 %v2258_v59, %v2243_v57  ;;  %v2248_v18 = vmul.f32 %v2247_v58, %v2243_v57 }
 0x801   : > { %v2212_v24 = vmul.f32 %v2211_v51, %v2203_v36 }
 0x802   : > { %v2224_v16 = vadd.f32 1.0, %v2223_v12  ;;  %v2260_v19 = vadd.f32 0.112945676, %v2259_v13  ;;  %v2249_v41 = vadd.f32 0.05243302, %v2248_v18 }
 0x803   : > { %v2213_v30 = vadd.f32 1.1283791, %v2212_v24 }
 0x804   : > { %2906 = vrcp.f32 %v2224_v16  ;;  %v2261_v40 = vmul.f32 %v2260_v19, %v2243_v57  ;;  %v2250_v53 = vmul.f32 %v2249_v41, %v2243_v57  ;;  %v2236_v26 = vand.u32 2147483648, %v2224_v16 }
 0x805   : > { %v2234_v27 = vand.u32 2147483647, %v2224_v16  ;;  %vm2230_vm13 = vweird.f32 %v2224_v16  ;;  %v2214_v49 = vmul.f32 %v2213_v30, %v3608_v35 }
 0x806   : > { %v2262_v42 = vadd.f32 0.4994258, %v2261_v40  ;;  %v2251_v39 = vadd.f32 0.18741608, %v2250_v53  ;;  %v2237_v32 = vor.u32 1.1754944e-38, %v2236_v26 }
 0x807   : > { %vm2235_vm15 = vcmp.eq.f32.partialorder %v2234_v27, 8.507059e+37 }
 0x808   : > { %v2263_v21 = vmul.f32 %v2262_v42, %v2243_v57  ;;  %v2252_v1 = vmul.f32 %v2251_v39, %v2243_v57 }
 0x80a   : > { %v2907_v23 = vpop.eup %2906  ;;  %v2264_v50 = vadd.f32 1.0, %v2263_v21  ;;  %v2253_v36 = vadd.f32 1.1283791, %v2252_v1 }
 0x80b   : > { %v2226_v52 = vmul.f32 %v2907_v23, %v2224_v16  ;;  %vm2231_vm12 = vweird.f32 %v2907_v23 }
 0x80c   : > { %2908 = vrcp.f32 %v2264_v50  ;;  %vm2232_vm14 = vmor %vm2230_vm13, %vm2231_vm12  ;;  %v2276_v63 = vand.u32 2147483648, %v2264_v50  ;;  %v2274_v4 = vand.u32 2147483647, %v2264_v50  ;;  %vm2270_vm1 = vweird.f32 %v2264_v50 }
 0x80d   : > { %v2227_v54 = vsub.f32 1.0, %v2226_v52  ;;  %v2254_v57 = vmul.f32 %v2253_v36, %v3615_v2  ;;  %v2863_v2 = vld [vmem:[%s3718_s2] ss:$0 sm:$0xff] }
 0x80e   : > { %v2277_v6 = vor.u32 1.1754944e-38, %v2276_v63  ;;  %vm2275_vm4 = vcmp.eq.f32.partialorder %v2274_v4, 8.507059e+37 }
 0x80f   : > { %v2228_v25 = vmul.f32 %v2907_v23, %v2227_v54 }
 0x811   : > { %v2229_v28 = vadd.f32 %v2907_v23, %v2228_v25 }
 0x812   : > { %v2909_v29 = vpop.eup %2908 }
 0x813   : > { %v2233_v31 = vsel %vm2232_vm14, %v2907_v23, %v2229_v28  ;;  %v2266_v9 = vmul.f32 %v2909_v29, %v2264_v50  ;;  %vm2271_vm0 = vweird.f32 %v2909_v29 }
 0x814   : > { %v2238_v22 = vsel %vm2235_vm15, %v2237_v32, %v2233_v31  ;;  %vm2272_vm3 = vmor %vm2270_vm1, %vm2271_vm0 }
 0x815   : > { %v2267_v62 = vsub.f32 1.0, %v2266_v9  ;;  %v2239_v3 = vmul.f32 %v2238_v22, %v2214_v49 }
 0x817   : > { %v2268_v8 = vmul.f32 %v2909_v29, %v2267_v62  ;;  %v2759_v7 = vclamps-f32 %v2239_v3, 1.0 }
 0x819   : > { %v2269_v5 = vadd.f32 %v2909_v29, %v2268_v8  ;;  %v2282_v35 = vadd.f32 1.0, %v2759_v7 }
 0x81b   : > { %v2273_v61 = vsel %vm2272_vm3, %v2909_v29, %v2269_v5  ;;  %v2284_v46 = vmul.f32 %v2282_v35, %v2198_v43 }
 0x81c   : > { %v2278_v10 = vsel %vm2275_vm4, %v2277_v6, %v2273_v61 }
 0x81d   : > { %v2279_v11 = vmul.f32 %v2278_v10, %v2254_v57 }
 0x81f   : > { %v2760_v15 = vclamps-f32 %v2279_v11, 1.0 }
 0x821   : > { %v2283_v45 = vadd.f32 1.0, %v2760_v15 }
 0x823   : > { %v2285_v17 = vmul.f32 %v2283_v45, %v2199_v44 }
 0x825   : > { %v2286_v47 = vpack.c.bf16 %v2285_v17, %v2284_v46 }
 0x827   : > { %2777 = vmatmul.msk.bf16.vlgmr.msra.gmra.mxu2 %vm2323_vm5, %v2286_v47 }
 0x8aa   : > { %v2336_v55 = vpop.f32.mrf.mxu2 }
 0x8ab   : > { %v2337_v56 = vadd.f32 %v2863_v2, %v2336_v55 }
 0x8ad   : > { %v2343_v58 = vrot.slane %v2337_v56, 1  ;;  %v2344_v59 = vrot.slane %v2337_v56, 2  ;;  %v2345_v12 = vrot.slane %v2337_v56, 3  ;;  %2351 = vst [vmem:[#allocation1] ss:$9 sm:$0xff] %v2337_v56  ;;  %v2346_v34 = vrot.slane %v2337_v56, 4 }
 0x8ae   : > { %v2347_v13 = vrot.slane %v2337_v56, 5  ;;  %v2348_v14 = vrot.slane %v2337_v56, 6  ;;  %v2349_v18 = vrot.slane %v2337_v56, 7 }
 0x8af   : > { %2353 = vst [vmem:[#allocation1 + $0x1] ss:$9 sm:$0xff] %v2343_v58 }
 0x8b0   : > { %2355 = vst [vmem:[#allocation1 + $0x2] ss:$9 sm:$0xff] %v2344_v59 }
 0x8b1   : > { %2357 = vst [vmem:[#allocation1 + $0x3] ss:$9 sm:$0xff] %v2345_v12 }
 0x8b2   : > { %2359 = vst [vmem:[#allocation1 + $0x4] ss:$9 sm:$0xff] %v2346_v34  ;;  %v2338_v0 = vpop.f32.mrf.mxu2 }
 0x8b3   : > { %v2339_v60 = vadd.f32 %v2863_v2, %v2338_v0 }
 0x8b5   : > { %v2350_v38 = vrot.slane %v2339_v60, 1 }
 0x8b9   : > { %v2360_v16 = vld [vmem:[#allocation1] sm:$0xff] }
 0x8ba   : > { %2361 = vst [vmem:[#allocation1] ss:$9 sm:$0xff] %v2347_v13  ;;  %v2369_v19 = vadd.f32 %v2360_v16, %v3567_v33 }
 0x8bb   : > { %2362 = vst [vmem:[#allocation1 + $0x1] ss:$9 sm:$0xff] %v2348_v14 }
 0x8bc   : > { %2363 = vst [vmem:[#allocation1 + $0x2] ss:$9 sm:$0xff] %v2349_v18 }
 0x8bd   : > { %2371 = vst.msk [vmem:[#allocation2] sm:$0x1f] %vm1001_vm2, %v2369_v19 }
 0x8be   : > { %2364 = vst [vmem:[#allocation1 + $0x3] ss:$9 sm:$0xff] %v2339_v60 }
 0x8bf   : > { %2365 = vst [vmem:[#allocation1 + $0x4] ss:$9 sm:$0xff] %v2350_v38 }
 0x8c5   : > { %2376 = sbr.rel (%p2778_p5) target bundleno = 2553 (0x9f9), region = 112 }
 0x8c6   : > { %v2366_v40 = vld [vmem:[#allocation1] sm:$0xff] }
 0x8c7   : > { %v2370_v20 = vadd.f32 %v2366_v40, %v3574_v37 }
 0x8c9   : > { %2372 = vst.msk [vmem:[#allocation2 + $0x8] sm:$0x1f] %vm1001_vm2, %v2370_v20 }
 0x8ca   : > { %v2381_v41 = vrot.slane %v2370_v20, 7  ;;  %vm2382_vm6 = vcmask 1041409   ;;  %vm2385_vm7 = vcmask 254976   ;;  %v2391_v42 = vmul.f32 %v2370_v20, %v2370_v20  ;;  %v2823_v50 = vld [vmem:[%s3684_s19 + $0x8] sm:$0xff]  ;;  %v2822_v54 = vld [vmem:[%s3684_s19] sm:$0xff] }
 0x8cb   : > { %v2390_v21 = vmul.f32 %v2369_v19, %v2369_v19  ;;  %2474 = vmatpush.bf16.msra.mxu0 %v2823_v50  ;;  %v2912_v62 = vld [vmem:[%s3719_s30] ss:$0 sm:$0xff]  ;;  %vm2481_vm11 = vcmask 74752  }
 0x8cc   : > { %v2383_v33 = vsel %vm2382_vm6, %v2381_v41, %v2369_v19  ;;  %v2394_v51 = vrot.slane %v2391_v42, 7  ;;  %v2913_v8 = vld [vmem:[%s3720_s27] ss:$0 sm:$0xff] }
 0x8cd   : > { %v2386_v23 = vsel %vm2385_vm7, %v2383_v33, 0.0  ;;  %v2914_v45 = vld [vmem:[%s3721_s1] ss:$0 sm:$0xff] }
 0x8ce   : > { %2387 = vadd.xlane.f32.xlu0 %v2386_v23  ;;  %v2395_v52 = vsel %vm2382_vm6, %v2394_v51, %v2390_v21 }
 0x8cf   : > { %v2397_v53 = vsel %vm2385_vm7, %v2395_v52, 0.0  ;;  %2475 = vmatpush.bf16.msra.mxu0 %v2822_v54 }
 0x8d6   : > { %2398 = vadd.xlane.f32.xlu0 %v2397_v53 }
 0x941   : > { %v2388_v37 = vpop.xlane.xlu0 %2387 }
 0x942   : > { %v2389_v24 = vmul.f32 %v2388_v37, %v3228_v48 }
 0x944   : > { %v2401_v26 = vmul.f32 %v2389_v24, %v2389_v24  ;;  %v2404_v9 = vrot.slane %v2389_v24, 1  ;;  %v2407_v49 = vsub.f32 %v2369_v19, %v2389_v24 }
 0x949   : > { %v2399_v25 = vpop.xlane.xlu0 %2398 }
 0x94a   : > { %v2400_v39 = vmul.f32 %v2399_v25, %v3228_v48  ;;  %v2408_v48 = vsub.f32 %v2370_v20, %v2404_v9 }
 0x94c   : > { %v2402_v27 = vsub.f32 %v2400_v39, %v2401_v26 }
 0x94e   : > { %v2409_v28 = vadd.f32 1e-05, %v2402_v27 }
 0x950   : > { %2915 = vrsqrt.f32 %v2409_v28  ;;  %vm2416_vm8 = vweird.f32 %v2409_v28 }
 0x956   : > { %v2916_v30 = vpop.eup %2915 }
 0x957   : > { %v2411_v29 = vmul.f32 %v2916_v30, %v2409_v28  ;;  %vm2417_vm2 = vweird.f32 %v2916_v30 }
 0x958   : > { %vm2418_vm9 = vmor %vm2416_vm8, %vm2417_vm2 }
 0x959   : > { %v2412_v31 = vmul.f32 %v2916_v30, %v2411_v29 }
 0x95b   : > { %v2413_v32 = vmul.f32 0.5, %v2412_v31 }
 0x95d   : > { %v2414_v1 = vsub.f32 1.5, %v2413_v32 }
 0x95f   : > { %v2415_v22 = vmul.f32 %v2916_v30, %v2414_v1 }
 0x961   : > { %v2419_v36 = vsel %vm2418_vm9, %v2916_v30, %v2415_v22 }
 0x962   : > { %v2421_v63 = vrot.slane %v2419_v36, 1  ;;  %v2424_v3 = vmul.f32 %v2419_v36, %v2407_v49 }
 0x964   : > { %v2425_v4 = vmul.f32 %v2421_v63, %v2408_v48  ;;  %v2429_v5 = vmul.f32 %v2912_v62, %v2424_v3 }
 0x966   : > { %v2430_v6 = vmul.f32 %v2912_v62, %v2425_v4  ;;  %v2434_v7 = vadd.f32 %v2913_v8, %v2429_v5 }
 0x968   : > { %v2435_v57 = vadd.f32 %v2913_v8, %v2430_v6  ;;  %v2436_v61 = vpack.c.bf16 %v2434_v7, %v2434_v7 }
 0x96a   : > { %v2437_v10 = vpack.c.bf16 %v2435_v57, %v2435_v57  ;;  %v2448_v35 = vunpack.c.l.b16 %v2436_v61 }
 0x96c   : > { %v2449_v11 = vunpack.c.l.b16 %v2437_v10 }
 0x96e   : > { %v2450_v15 = vrot.slane %v2449_v11, 7 }
 0x970   : > { %v2451_v43 = vsel %vm2382_vm6, %v2450_v15, %v2448_v35 }
 0x971   : > { %v2452_v44 = vpack.c.b16 %v2451_v43, %v2451_v43 }
 0x973   : > { %2787 = vmatmul.msk.bf16.vlgmr.msra.gmra.mxu0 %vm1119_vm10, %v2452_v44 }
 0x9f0   : > { %v2477_v46 = vpop.f32.mrf.mxu0 }
 0x9f1   : > { %v2478_v17 = vadd.f32 %v2914_v45, %v2477_v46 }
 0x9f3   : > { %2482 = vst.msk [vmem:[#allocation4] sm:$0x3] %vm2481_vm11, %v2478_v17 }
 0x9f8   : > { %v2479_v47 = vpop.f32.mrf.mxu0 }
 0x9f9 PF: > { %p2828_p6 = scmp.eq.s32.totalorder %s3090_s25, 1  ;;  %s2973_s3 = smov [#allocation4]  }
 0x9fa   : > { %s2489_s0 = sshll.u32 %s2973_s3, 4  ;;  %s3722_s26 = sld [smem:[#allocation19_spill]]  ;;  %s2490_s0 = int_to_ptr.vmem [resolvable:$true] %s2489_s0 }
 0xa00   : > { %s2491_s17 = sshll.u32 %s3722_s26, 4  ;;  %s2492_s17 = int_to_ptr.hbm [resolvable:$true] %s2491_s17 }
 0xa01   : > { %2825 = dma.vmem_to_hbm [thread:$0]  (%p2828_p6), %s2490_s0, 32, %s2492_s17, [#allocation5]  }
 0xa02   : > { %2950 = dma.done.wait (%p2828_p6), [#allocation5], 32  }
 0xa03   : > { %2952 = vsyncadd (%p2828_p6), [#allocation5], 4294967264 }
 0xa04 PF: > { %s3723_s9 = sld [smem:[#allocation7_spill]] }
 0xa0a   : > { %s32_s2 = sadd.s32 1, %s3723_s9  }
 0xa0b   : > { %p29_p7 = scmp.ge.s32.totalorder %s32_s2, 4  }
 0xa0d   :  { %31 = sbr.rel (!%p29_p7) target bundleno = 14 (0xe), region = 249 }
 0xa12   :  { %2505 = vsyncpa [#allocation5], 1 }
 0xa13   :  { %2507 = vsyncpa [#allocation5 + $0x1], 1 }

</bundles_post_ra>
